<compile_context>
chip_gen: v7x
topology: tpu7x:2x2x1
jax: 0.10.0
libtpu: 0.0.40
codegen_flags: <defaults>
</compile_context>

<pallas_src>
import functools

import jax
import jax.numpy as jnp
from jax.experimental import pallas as pl
from jax.experimental.pallas import tpu as pltpu

# Constants matching the reference chemistry GNN code.
NUM_ATOM_TYPE = 120
NUM_CHIRALITY_TAG = 3
NUM_BOND_TYPE = 6
NUM_BOND_DIRECTION = 3
NUM_EDGE_TYPES = NUM_BOND_TYPE * NUM_BOND_DIRECTION  # 18

BN_EPS = 1e-5


def _round_up(x, m):
    return (x + m - 1) // m * m


def gin_stack_kernel(x_ref, adj_ref, cnt_ref, etab_ref, w1_ref, w2_ref,
                     vec_ref, o_ref, *, n_real, num_layers):
    """One grid step == one full GIN layer; h is carried in o_ref (f32)."""
    layer = pl.program_id(0)
    n_pad, d_pad = o_ref.shape

    # Layer 0: seed the resident carry with the input node embeddings.
    @pl.when(layer == 0)
    def _():
        o_ref[...] = x_ref[...]

    h = o_ref[...]                                       # [Np, Dp] f32 carry

    # Row-validity mask computed in-kernel (no [Np, 1] resident input / DMA).
    mask = (jax.lax.broadcasted_iota(jnp.int32, (n_pad, 1), 0)
            < n_real).astype(jnp.float32)

    # GIN 'add' aggregation with edge features:
    #   aggr[i] = sum_{e: dst=i} (h[src(e)] + edge_emb(e))
    #           = (A @ h)[i] + (counts @ edge_table)[i]
    # bf16 MXU operands (A, counts, edge table stored bf16; h cast here),
    # f32 accumulation.
    aggr = (jnp.dot(adj_ref[...], h.astype(jnp.bfloat16),
                    preferred_element_type=jnp.float32)
            + jnp.dot(cnt_ref[...], etab_ref[0],
                      preferred_element_type=jnp.float32))

    # Packed per-layer vectors: row 0 = b1 (width Hp), rows 1..3 = b2 / gamma /
    # beta (width Dp, zero-padded to Hp).
    vecs = vec_ref[0]                                    # [4, Hp] f32
    b1 = vecs[0:1, :]
    b2 = vecs[1:2, :d_pad]
    gamma = vecs[2:3, :d_pad]
    beta = vecs[3:4, :d_pad]

    # MLP: Linear(D, 2D) -> ReLU -> Linear(2D, D); bf16 MXU, f32 accumulate.
    z = jnp.dot(aggr.astype(jnp.bfloat16), w1_ref[0],
                preferred_element_type=jnp.float32) + b1
    z = jnp.maximum(z, 0.0)
    z = jnp.dot(z.astype(jnp.bfloat16), w2_ref[0],
                preferred_element_type=jnp.float32) + b2

    # BatchNorm1d (training mode, biased variance), single pass over z,
    # statistics restricted to the n_real valid rows via the mask.
    zm = z * mask
    inv_n = 1.0 / float(n_real)
    mean = jnp.sum(zm, axis=0, keepdims=True) * inv_n
    msq = jnp.sum(zm * z, axis=0, keepdims=True) * inv_n
    var = msq - mean * mean
    hn = (z - mean) * jax.lax.rsqrt(var + BN_EPS)
    # gamma/beta are ZERO-padded in the lane-padded columns; that is what keeps
    # the padded emb columns of h at exactly zero. Do not switch to ones-pad.
    hn = hn * gamma + beta

    # Keep padded rows at exactly zero so they never pollute A @ h.
    o_ref[...] = hn * mask

    # Intermediate layers: F.relu (dropout p=0 == identity); last layer: id.
    # Scalar-predicated instead of a broadcast select + unconditional relu.
    @pl.when(layer != num_layers - 1)
    def _():
        o_ref[...] = jnp.maximum(o_ref[...], 0.0)


def _vmem_budget_cap_bytes():
    """Per-generation VMEM cap: leave ~16 MiB headroom below physical VMEM."""
    phys = 64 << 20   # conservative default == v7x physical VMEM
    try:
        info = pltpu.get_tpu_info()
        for attr in ("vmem_capacity_bytes", "vmem_bytes", "vmem_size_bytes"):
            v = getattr(info, attr, None)
            if v:
                phys = int(v)
                break
    except Exception:
        pass
    return max(min(phys - (16 << 20), 112 << 20), 32 << 20)


def run_gin_stack(h0, adj, counts, etab, w1, w2, vecs, *, n_real, num_layers):
    n_pad, d_pad = h0.shape
    h_hid = w1.shape[-1]
    net = counts.shape[-1]

    kernel = functools.partial(gin_stack_kernel, n_real=n_real,
                               num_layers=num_layers)

    # Honest VMEM estimate: residents (x1 when single-buffered), output carry,
    # double-buffered streamed per-layer weights, and the live f32/bf16 temps.
    def estimate(resident_bufs):
        resident = (n_pad * d_pad * 4            # h0 (f32)
                    + n_pad * n_pad * 2          # adj (bf16)
                    + n_pad * net * 2)           # counts (bf16)
        carry = 2 * n_pad * d_pad * 4            # output carry (assume 2 bufs)
        per_layer = (net * d_pad * 2             # edge table (bf16)
                     + d_pad * h_hid * 2         # W1 (bf16)
                     + h_hid * d_pad * 2         # W2 (bf16)
                     + 4 * h_hid * 4)            # packed vectors (f32)
        interm = (n_pad * d_pad * 4              # aggr
                  + 2 * n_pad * h_hid * 4        # z / relu temp
                  + 2 * n_pad * d_pad * 4        # hn / masked temps
                  + n_pad * (d_pad + h_hid) * 2)  # bf16 cast temps
        return resident_bufs * resident + carry + 2 * per_layer + interm

    cap = _vmem_budget_cap_bytes()

    def build(single_buffer_residents):
        res_kwargs = ({"pipeline_mode": pl.Buffered(1)}
                      if single_buffer_residents else {})

        def resident(shape):
            # Constant block index across the layer axis -> DMA'd once,
            # stays in VMEM; single-buffered when supported.
            return pl.BlockSpec(shape, lambda l: (0,) * len(shape),
                                **res_kwargs)

        def per_layer(shape):
            return pl.BlockSpec((1,) + shape,
                                lambda l: (l,) + (0,) * len(shape))

        est = estimate(1 if single_buffer_residents else 2)
        vmem_limit = int(min(max(int(est * 1.25) + (2 << 20), 8 << 20), cap))

        return pl.pallas_call(
            kernel,
            out_shape=jax.ShapeDtypeStruct((n_pad, d_pad), jnp.float32),
            grid_spec=pltpu.PrefetchScalarGridSpec(
                num_scalar_prefetch=0,
                grid=(num_layers,),
                in_specs=[
                    resident((n_pad, d_pad)),     # h0 (input node embeddings)
                    resident((n_pad, n_pad)),     # adjacency counts, bf16
                    resident((n_pad, net)),       # edge-type counts, bf16
                    per_layer((net, d_pad)),      # edge embedding table, bf16
                    per_layer((d_pad, h_hid)),    # W1, bf16
                    per_layer((h_hid, d_pad)),    # W2, bf16
                    per_layer((4, h_hid)),        # b1 | b2 | gamma | beta, f32
                ],
                out_specs=pl.BlockSpec((n_pad, d_pad), lambda l: (0, 0)),
            ),
            compiler_params=pltpu.CompilerParams(
                dimension_semantics=("arbitrary",),   # h carries layer->layer
                vmem_limit_bytes=vmem_limit),
        )

    args = (h0, adj, counts, etab, w1, w2, vecs)
    try:
        return build(True)(*args)
    except Exception:
        # TODO(synk): drop this fallback once pl.Buffered(1) on resident
        # inputs is supported everywhere we run.
        return build(False)(*args)


def xavier_uniform(key, shape):
    fan_in, fan_out = shape[-2], shape[-1]
    a = jnp.sqrt(6.0 / (fan_in + fan_out))
    return jax.random.uniform(key, shape, jnp.float32, minval=-a, maxval=a)


def init_params(key, num_layer, emb_dim):
    keys = jax.random.split(key, 2 + 6 * num_layer)
    params = {
        "x_emb1": xavier_uniform(keys[0], (NUM_ATOM_TYPE, emb_dim)),
        "x_emb2": xavier_uniform(keys[1], (NUM_CHIRALITY_TAG, emb_dim)),
        "layers": [],
    }
    b1_bound = 1.0 / float(jnp.sqrt(emb_dim))
    b2_bound = 1.0 / float(jnp.sqrt(2 * emb_dim))
    for l in range(num_layer):
        k = keys[2 + 6 * l: 2 + 6 * (l + 1)]
        layer = {
            "edge_emb1": xavier_uniform(k[0], (NUM_BOND_TYPE, emb_dim)),
            "edge_emb2": xavier_uniform(k[1], (NUM_BOND_DIRECTION, emb_dim)),
            "w1": xavier_uniform(k[2], (emb_dim, 2 * emb_dim)),
            "b1": jax.random.uniform(k[3], (1, 2 * emb_dim), jnp.float32,
                                     minval=-b1_bound, maxval=b1_bound),
            "w2": xavier_uniform(k[4], (2 * emb_dim, emb_dim)),
            "b2": jax.random.uniform(k[5], (1, emb_dim), jnp.float32,
                                     minval=-b2_bound, maxval=b2_bound),
            "gamma": jnp.ones((1, emb_dim), jnp.float32),
            "beta": jnp.zeros((1, emb_dim), jnp.float32),
        }
        params["layers"].append(layer)
    return params


def gnn_forward(params, node_feats, edge_index, edge_attr, num_layer):
    """GNN.forward with gnn_type='gin', JK='last', drop_ratio=0 (training)."""
    n = node_feats.shape[0]
    d = params["x_emb1"].shape[1]
    n_pad = _round_up(n, 8)
    d_pad = _round_up(d, 128)       # lane-dense node/emb dim
    h_hid = _round_up(2 * d, 128)   # lane-dense MLP hidden dim

    # --- glue (once, outside the layer loop) -------------------------------
    # add self loops + self-loop edge attr [4, 0]
    self_loops = jnp.stack([jnp.arange(n, dtype=edge_index.dtype)] * 2, axis=0)
    edge_index_sl = jnp.concatenate([edge_index, self_loops], axis=1)
    self_loop_attr = jnp.concatenate(
        [jnp.full((n, 1), 4, dtype=edge_attr.dtype),
         jnp.zeros((n, 1), dtype=edge_attr.dtype)], axis=1)
    edge_attr_sl = jnp.concatenate([edge_attr, self_loop_attr], axis=0)

    src = edge_index_sl[0]
    dst = edge_index_sl[1]

    # Dense adjacency counts A[i, j] = #edges j -> i, via segment-sum.
    # NOTE: bf16 is exact for integer counts <= 256 (always true for
    # molecular graphs); counts above that would be rounded.
    adj = jnp.zeros((n_pad, n_pad), jnp.float32).at[dst, src].add(1.0)
    adj = adj.astype(jnp.bfloat16)

    # Edge-type count matrix counts[i, t], t = bond_type * 3 + bond_direction.
    etype = edge_attr_sl[:, 0] * NUM_BOND_DIRECTION + edge_attr_sl[:, 1]
    counts = jnp.zeros((n_pad, NUM_EDGE_TYPES), jnp.float32).at[dst, etype].add(1.0)
    counts = counts.astype(jnp.bfloat16)

    # Node input embedding (tiny table lookup).
    h0 = (jnp.take(params["x_emb1"], node_feats[:, 0], axis=0)
          + jnp.take(params["x_emb2"], node_feats[:, 1], axis=0))
    h0 = jnp.pad(h0, ((0, n_pad - n), (0, d_pad - d)))

    # Stack per-layer parameters, zero-padded lane-dense.  Matmul operands in
    # bf16 (MXU); the small per-layer vectors are packed into one [L, 4, Hp]
    # f32 array so each grid step streams 4 DMAs instead of 7.
    etab_l, w1_l, w2_l, vec_l = [], [], [], []
    for lp in params["layers"]:
        etab = (lp["edge_emb1"][:, None, :]
                + lp["edge_emb2"][None, :, :]).reshape(NUM_EDGE_TYPES, d)
        etab_l.append(
            jnp.pad(etab, ((0, 0), (0, d_pad - d))).astype(jnp.bfloat16))
        w1_l.append(
            jnp.pad(lp["w1"], ((0, d_pad - d), (0, h_hid - 2 * d))).astype(jnp.bfloat16))
        w2_l.append(
            jnp.pad(lp["w2"], ((0, h_hid - 2 * d), (0, d_pad - d))).astype(jnp.bfloat16))
        b1 = jnp.pad(lp["b1"], ((0, 0), (0, h_hid - 2 * d)))
        # gamma/beta (and b2) MUST stay zero-padded in the lane-padded columns
        # so the padded emb columns of h remain exactly zero through BN.
        b2 = jnp.pad(lp["b2"], ((0, 0), (0, h_hid - d)))
        ga = jnp.pad(lp["gamma"], ((0, 0), (0, h_hid - d)))
        be = jnp.pad(lp["beta"], ((0, 0), (0, h_hid - d)))
        vec_l.append(jnp.concatenate([b1, b2, ga, be], axis=0))   # [4, Hp]
    etab_all = jnp.stack(etab_l)    # [L, 18, Dp] bf16
    w1_all = jnp.stack(w1_l)        # [L, Dp, Hp] bf16
    w2_all = jnp.stack(w2_l)        # [L, Hp, Dp] bf16
    vec_all = jnp.stack(vec_l)      # [L, 4, Hp]  f32

    # TODO(synk): for very large N (~>4k on v7x, ~>8k on v5e/v6e) tile the node
    # axis (adj blocked (tn, Np), per-tile h carry, cross-tile/core BN stat
    # accumulation + finalize) and mark it 'parallel' to use v7x's second TC;
    # full-N blocks are correct and fastest at typical molecular-graph sizes.
    out = run_gin_stack(h0, adj, counts, etab_all, w1_all, w2_all, vec_all,
                        n_real=n, num_layers=num_layer)

    # JK == 'last'; strip padding.
    return out[:n, :d]


if __name__ == "__main__":
    num_layer = 2
    emb_dim = 32
    n_nodes = 16
    n_edges = 32

    key = jax.random.PRNGKey(0)
    k_param, k_atom, k_chir, k_src, k_dst, k_bt, k_bd = jax.random.split(key, 7)

    params = init_params(k_param, num_layer, emb_dim)

    node_feats = jnp.stack(
        [jax.random.randint(k_atom, (n_nodes,), 0, NUM_ATOM_TYPE),
         jax.random.randint(k_chir, (n_nodes,), 0, NUM_CHIRALITY_TAG)],
        axis=1).astype(jnp.int32)                                   # [N, 2]
    edge_index = jnp.stack(
        [jax.random.randint(k_src, (n_edges,), 0, n_nodes),
         jax.random.randint(k_dst, (n_edges,), 0, n_nodes)],
        axis=0).astype(jnp.int32)                                   # [2, E]
    edge_attr = jnp.stack(
        [jax.random.randint(k_bt, (n_edges,), 0, 4),
         jax.random.randint(k_bd, (n_edges,), 0, NUM_BOND_DIRECTION)],
        axis=1).astype(jnp.int32)                                   # [E, 2]

    out = gnn_forward(params, node_feats, edge_index, edge_attr, num_layer)
    out = jax.block_until_ready(out)
    assert out.shape == (n_nodes, emb_dim)
    assert bool(jnp.all(jnp.isfinite(out)))
    print("KERNEL_OK")
</pallas_src>

<mosaic_0001>
module attributes {stable_mosaic.version = 11 : i64} {
  func.func @gin_stack_kernel(%arg0: i32, %arg1: memref<16x128xf32, #tpu.memory_space<vmem>>, %arg2: memref<16x16xbf16, #tpu.memory_space<vmem>>, %arg3: memref<16x18xbf16, #tpu.memory_space<vmem>>, %arg4: memref<1x18x128xbf16, #tpu.memory_space<vmem>>, %arg5: memref<1x128x128xbf16, #tpu.memory_space<vmem>>, %arg6: memref<1x128x128xbf16, #tpu.memory_space<vmem>>, %arg7: memref<1x4x128xf32, #tpu.memory_space<vmem>>, %arg8: memref<16x128xf32, #tpu.memory_space<vmem>>) attributes {dimension_semantics = [#tpu.dimension_semantics<arbitrary>], iteration_bounds = array<i64: 2>, scalar_prefetch = 0 : i64, scratch_operands = 0 : i64, tpu.core_type = #tpu.core_type<tc>, window_params = [{pipeline_mode = #tpu.pipeline_mode<synchronous>, transform_indices = @transform_0, window_bounds = array<i64: 16, 128>}, {pipeline_mode = #tpu.pipeline_mode<synchronous>, transform_indices = @transform_1, window_bounds = array<i64: 16, 16>}, {pipeline_mode = #tpu.pipeline_mode<synchronous>, transform_indices = @transform_2, window_bounds = array<i64: 16, 18>}, {transform_indices = @transform_3, window_bounds = array<i64: 1, 18, 128>}, {transform_indices = @transform_4, window_bounds = array<i64: 1, 128, 128>}, {transform_indices = @transform_5, window_bounds = array<i64: 1, 128, 128>}, {transform_indices = @transform_6, window_bounds = array<i64: 1, 4, 128>}, {pipeline_mode = #tpu.pipeline_mode<synchronous>, transform_indices = @transform_7, window_bounds = array<i64: 16, 128>}]} {
    %c0_i32 = arith.constant 0 : i32
    %0 = arith.cmpi eq, %arg0, %c0_i32 : i32
    %1 = arith.extui %0 : i1 to i32
    %c0_i32_0 = arith.constant 0 : i32
    %2 = arith.cmpi ne, %1, %c0_i32_0 : i32
    scf.if %2 {
      %c0_30 = arith.constant 0 : index
      %c0_31 = arith.constant 0 : index
      %67 = vector.load %arg1[%c0_30, %c0_31] : memref<16x128xf32, #tpu.memory_space<vmem>>, vector<16x128xf32>
      %c0_32 = arith.constant 0 : index
      %c0_33 = arith.constant 0 : index
      %68 = vector.load %arg8[%c0_32, %c0_33] : memref<16x128xf32, #tpu.memory_space<vmem>>, vector<16x128xf32>
      tpu.vector_store %arg8[%c0_32, %c0_33], %67 {strides = array<i32>} : memref<16x128xf32, #tpu.memory_space<vmem>>, vector<16x128xf32>,
    } else {
    }
    %c0 = arith.constant 0 : index
    %c0_1 = arith.constant 0 : index
    %3 = vector.load %arg8[%c0, %c0_1] : memref<16x128xf32, #tpu.memory_space<vmem>>, vector<16x128xf32>
    %4 = tpu.iota {dimensions = array<i32: 0>} : vector<16x1xi32>
    %c16_i32 = arith.constant 16 : i32
    %5 = vector.broadcast %c16_i32 : i32 to vector<16x1xi32>
    %6 = arith.cmpi slt, %4, %5 : vector<16x1xi32>
    %7 = arith.extui %6 : vector<16x1xi1> to vector<16x1xi32>
    %8 = arith.sitofp %7 : vector<16x1xi32> to vector<16x1xf32>
    %c0_2 = arith.constant 0 : index
    %c0_3 = arith.constant 0 : index
    %9 = vector.load %arg2[%c0_2, %c0_3] : memref<16x16xbf16, #tpu.memory_space<vmem>>, vector<16x16xbf16>
    %10 = arith.truncf %3 : vector<16x128xf32> to vector<16x128xbf16>
    %cst = arith.constant dense<0.000000e+00> : vector<16x128xf32>
    %11 = tpu.matmul %9, %10, %cst {dimension_numbers = #tpu.dot_dimension_numbers<[1], [0], [0], [1], [0, 0, 1, 1], [], []>} : vector<16x16xbf16>, vector<16x128xbf16>, vector<16x128xf32> -> vector<16x128xf32>
    %c0_4 = arith.constant 0 : index
    %c0_5 = arith.constant 0 : index
    %12 = vector.load %arg3[%c0_4, %c0_5] : memref<16x18xbf16, #tpu.memory_space<vmem>>, vector<16x18xbf16>
    %c0_6 = arith.constant 0 : index
    %c0_7 = arith.constant 0 : index
    %c0_8 = arith.constant 0 : index
    %13 = vector.load %arg4[%c0_6, %c0_7, %c0_8] : memref<1x18x128xbf16, #tpu.memory_space<vmem>>, vector<1x18x128xbf16>
    %14 = vector.shape_cast %13 : vector<1x18x128xbf16> to vector<18x128xbf16>
    %cst_9 = arith.constant dense<0.000000e+00> : vector<16x128xf32>
    %15 = tpu.matmul %12, %14, %cst_9 {dimension_numbers = #tpu.dot_dimension_numbers<[1], [0], [0], [1], [0, 0, 1, 1], [], []>} : vector<16x18xbf16>, vector<18x128xbf16>, vector<16x128xf32> -> vector<16x128xf32>
    %16 = arith.addf %11, %15 : vector<16x128xf32>
    %c0_10 = arith.constant 0 : index
    %c0_11 = arith.constant 0 : index
    %c0_12 = arith.constant 0 : index
    %17 = vector.load %arg7[%c0_10, %c0_11, %c0_12] : memref<1x4x128xf32, #tpu.memory_space<vmem>>, vector<1x4x128xf32>
    %18 = vector.shape_cast %17 : vector<1x4x128xf32> to vector<4x128xf32>
    %19 = vector.extract_strided_slice %18 {offsets = [0, 0], sizes = [1, 128], strides = [1, 1]} : vector<4x128xf32> to vector<1x128xf32>
    %20 = vector.extract_strided_slice %18 {offsets = [1, 0], sizes = [1, 128], strides = [1, 1]} : vector<4x128xf32> to vector<1x128xf32>
    %21 = vector.extract_strided_slice %18 {offsets = [2, 0], sizes = [1, 128], strides = [1, 1]} : vector<4x128xf32> to vector<1x128xf32>
    %22 = vector.extract_strided_slice %18 {offsets = [3, 0], sizes = [1, 128], strides = [1, 1]} : vector<4x128xf32> to vector<1x128xf32>
    %23 = arith.truncf %16 : vector<16x128xf32> to vector<16x128xbf16>
    %c0_13 = arith.constant 0 : index
    %c0_14 = arith.constant 0 : index
    %c0_15 = arith.constant 0 : index
    %24 = vector.load %arg5[%c0_13, %c0_14, %c0_15] : memref<1x128x128xbf16, #tpu.memory_space<vmem>>, vector<1x128x128xbf16>
    %25 = vector.shape_cast %24 : vector<1x128x128xbf16> to vector<128x128xbf16>
    %cst_16 = arith.constant dense<0.000000e+00> : vector<16x128xf32>
    %26 = tpu.matmul %23, %25, %cst_16 {dimension_numbers = #tpu.dot_dimension_numbers<[1], [0], [0], [1], [0, 0, 1, 1], [], []>} : vector<16x128xbf16>, vector<128x128xbf16>, vector<16x128xf32> -> vector<16x128xf32>
    %27 = vector.broadcast %19 : vector<1x128xf32> to vector<16x128xf32>
    %28 = arith.addf %26, %27 : vector<16x128xf32>
    %cst_17 = arith.constant 0.000000e+00 : f32
    %29 = vector.broadcast %cst_17 : f32 to vector<16x128xf32>
    %30 = arith.maximumf %28, %29 : vector<16x128xf32>
    %31 = arith.truncf %30 : vector<16x128xf32> to vector<16x128xbf16>
    %c0_18 = arith.constant 0 : index
    %c0_19 = arith.constant 0 : index
    %c0_20 = arith.constant 0 : index
    %32 = vector.load %arg6[%c0_18, %c0_19, %c0_20] : memref<1x128x128xbf16, #tpu.memory_space<vmem>>, vector<1x128x128xbf16>
    %33 = vector.shape_cast %32 : vector<1x128x128xbf16> to vector<128x128xbf16>
    %cst_21 = arith.constant dense<0.000000e+00> : vector<16x128xf32>
    %34 = tpu.matmul %31, %33, %cst_21 {dimension_numbers = #tpu.dot_dimension_numbers<[1], [0], [0], [1], [0, 0, 1, 1], [], []>} : vector<16x128xbf16>, vector<128x128xbf16>, vector<16x128xf32> -> vector<16x128xf32>
    %35 = vector.broadcast %20 : vector<1x128xf32> to vector<16x128xf32>
    %36 = arith.addf %34, %35 : vector<16x128xf32>
    %37 = vector.broadcast %8 : vector<16x1xf32> to vector<16x128xf32>
    %38 = arith.mulf %36, %37 : vector<16x128xf32>
    %cst_22 = arith.constant dense<0.000000e+00> : vector<128xf32>
    %39 = vector.multi_reduction <add>, %38, %cst_22 [0] : vector<16x128xf32> to vector<128xf32>
    %40 = vector.shape_cast %39 : vector<128xf32> to vector<1x128xf32>
    %cst_23 = arith.constant 6.250000e-02 : f32
    %41 = vector.broadcast %cst_23 : f32 to vector<1x128xf32>
    %42 = arith.mulf %40, %41 : vector<1x128xf32>
    %43 = arith.mulf %38, %36 : vector<16x128xf32>
    %cst_24 = arith.constant dense<0.000000e+00> : vector<128xf32>
    %44 = vector.multi_reduction <add>, %43, %cst_24 [0] : vector<16x128xf32> to vector<128xf32>
    %45 = vector.shape_cast %44 : vector<128xf32> to vector<1x128xf32>
    %cst_25 = arith.constant 6.250000e-02 : f32
    %46 = vector.broadcast %cst_25 : f32 to vector<1x128xf32>
    %47 = arith.mulf %45, %46 : vector<1x128xf32>
    %48 = arith.mulf %42, %42 : vector<1x128xf32>
    %49 = arith.subf %47, %48 : vector<1x128xf32>
    %50 = vector.broadcast %42 : vector<1x128xf32> to vector<16x128xf32>
    %51 = arith.subf %36, %50 : vector<16x128xf32>
    %cst_26 = arith.constant 9.99999974E-6 : f32
    %52 = vector.broadcast %cst_26 : f32 to vector<1x128xf32>
    %53 = arith.addf %49, %52 : vector<1x128xf32>
    %54 = math.rsqrt %53 : vector<1x128xf32>
    %55 = vector.broadcast %54 : vector<1x128xf32> to vector<16x128xf32>
    %56 = arith.mulf %51, %55 : vector<16x128xf32>
    %57 = vector.broadcast %21 : vector<1x128xf32> to vector<16x128xf32>
    %58 = arith.mulf %56, %57 : vector<16x128xf32>
    %59 = vector.broadcast %22 : vector<1x128xf32> to vector<16x128xf32>
    %60 = arith.addf %58, %59 : vector<16x128xf32>
    %61 = vector.broadcast %8 : vector<16x1xf32> to vector<16x128xf32>
    %62 = arith.mulf %60, %61 : vector<16x128xf32>
    %c0_27 = arith.constant 0 : index
    %c0_28 = arith.constant 0 : index
    %63 = vector.load %arg8[%c0_27, %c0_28] : memref<16x128xf32, #tpu.memory_space<vmem>>, vector<16x128xf32>
    tpu.vector_store %arg8[%c0_27, %c0_28], %62 {strides = array<i32>} : memref<16x128xf32, #tpu.memory_space<vmem>>, vector<16x128xf32>,
    %c1_i32 = arith.constant 1 : i32
    %64 = arith.cmpi ne, %arg0, %c1_i32 : i32
    %65 = arith.extui %64 : i1 to i32
    %c0_i32_29 = arith.constant 0 : i32
    %66 = arith.cmpi ne, %65, %c0_i32_29 : i32
    scf.if %66 {
      %c0_30 = arith.constant 0 : index
      %c0_31 = arith.constant 0 : index
      %67 = vector.load %arg8[%c0_30, %c0_31] : memref<16x128xf32, #tpu.memory_space<vmem>>, vector<16x128xf32>
      %cst_32 = arith.constant 0.000000e+00 : f32
      %68 = vector.broadcast %cst_32 : f32 to vector<16x128xf32>
      %69 = arith.maximumf %67, %68 : vector<16x128xf32>
      %c0_33 = arith.constant 0 : index
      %c0_34 = arith.constant 0 : index
      %70 = vector.load %arg8[%c0_33, %c0_34] : memref<16x128xf32, #tpu.memory_space<vmem>>, vector<16x128xf32>
      tpu.vector_store %arg8[%c0_33, %c0_34], %69 {strides = array<i32>} : memref<16x128xf32, #tpu.memory_space<vmem>>, vector<16x128xf32>,
    } else {
    }
    return
  }
  func.func @transform_0(%arg0: i32) -> (i32, i32) {
    %c0_i32 = arith.constant 0 : i32
    %c0_i32_0 = arith.constant 0 : i32
    %c0_i32_1 = arith.constant 0 : i32
    return %c0_i32, %c0_i32_0 : i32, i32
  }
  func.func @transform_1(%arg0: i32) -> (i32, i32) {
    %c0_i32 = arith.constant 0 : i32
    %c0_i32_0 = arith.constant 0 : i32
    %c0_i32_1 = arith.constant 0 : i32
    return %c0_i32, %c0_i32_0 : i32, i32
  }
  func.func @transform_2(%arg0: i32) -> (i32, i32) {
    %c0_i32 = arith.constant 0 : i32
    %c0_i32_0 = arith.constant 0 : i32
    %c0_i32_1 = arith.constant 0 : i32
    return %c0_i32, %c0_i32_0 : i32, i32
  }
  func.func @transform_3(%arg0: i32) -> (i32, i32, i32) {
    %c0_i32 = arith.constant 0 : i32
    %c0_i32_0 = arith.constant 0 : i32
    %c0_i32_1 = arith.constant 0 : i32
    return %arg0, %c0_i32, %c0_i32_0 : i32, i32, i32
  }
  func.func @transform_4(%arg0: i32) -> (i32, i32, i32) {
    %c0_i32 = arith.constant 0 : i32
    %c0_i32_0 = arith.constant 0 : i32
    %c0_i32_1 = arith.constant 0 : i32
    return %arg0, %c0_i32, %c0_i32_0 : i32, i32, i32
  }
  func.func @transform_5(%arg0: i32) -> (i32, i32, i32) {
    %c0_i32 = arith.constant 0 : i32
    %c0_i32_0 = arith.constant 0 : i32
    %c0_i32_1 = arith.constant 0 : i32
    return %arg0, %c0_i32, %c0_i32_0 : i32, i32, i32
  }
  func.func @transform_6(%arg0: i32) -> (i32, i32, i32) {
    %c0_i32 = arith.constant 0 : i32
    %c0_i32_0 = arith.constant 0 : i32
    %c0_i32_1 = arith.constant 0 : i32
    return %arg0, %c0_i32, %c0_i32_0 : i32, i32, i32
  }
  func.func @transform_7(%arg0: i32) -> (i32, i32) {
    %c0_i32 = arith.constant 0 : i32
    %c0_i32_0 = arith.constant 0 : i32
    %c0_i32_1 = arith.constant 0 : i32
    return %c0_i32, %c0_i32_0 : i32, i32
  }
}

module attributes {stable_mosaic.version = 11 : i64} {
  func.func @gin_stack_kernel(%arg0: i32, %arg1: memref<16x128xf32, #tpu.memory_space<vmem>>, %arg2: memref<16x16xbf16, #tpu.memory_space<vmem>>, %arg3: memref<16x18xbf16, #tpu.memory_space<vmem>>, %arg4: memref<1x18x128xbf16, #tpu.memory_space<vmem>>, %arg5: memref<1x128x128xbf16, #tpu.memory_space<vmem>>, %arg6: memref<1x128x128xbf16, #tpu.memory_space<vmem>>, %arg7: memref<1x4x128xf32, #tpu.memory_space<vmem>>, %arg8: memref<16x128xf32, #tpu.memory_space<vmem>>) attributes {dimension_semantics = [#tpu.dimension_semantics<arbitrary>], iteration_bounds = array<i64: 2>, scalar_prefetch = 0 : i64, scratch_operands = 0 : i64, tpu.core_type = #tpu.core_type<tc>, window_params = [{pipeline_mode = #tpu.pipeline_mode<synchronous>, transform_indices = @transform_0, window_bounds = array<i64: 16, 128>}, {pipeline_mode = #tpu.pipeline_mode<synchronous>, transform_indices = @transform_1, window_bounds = array<i64: 16, 16>}, {pipeline_mode = #tpu.pipeline_mode<synchronous>, transform_indices = @transform_2, window_bounds = array<i64: 16, 18>}, {transform_indices = @transform_3, window_bounds = array<i64: 1, 18, 128>}, {transform_indices = @transform_4, window_bounds = array<i64: 1, 128, 128>}, {transform_indices = @transform_5, window_bounds = array<i64: 1, 128, 128>}, {transform_indices = @transform_6, window_bounds = array<i64: 1, 4, 128>}, {pipeline_mode = #tpu.pipeline_mode<synchronous>, transform_indices = @transform_7, window_bounds = array<i64: 16, 128>}]} {
    %c0_i32 = arith.constant 0 : i32
    %0 = arith.cmpi eq, %arg0, %c0_i32 : i32
    %1 = arith.extui %0 : i1 to i32
    %c0_i32_0 = arith.constant 0 : i32
    %2 = arith.cmpi ne, %1, %c0_i32_0 : i32
    scf.if %2 {
      %c0_30 = arith.constant 0 : index
      %c0_31 = arith.constant 0 : index
      %67 = vector.load %arg1[%c0_30, %c0_31] : memref<16x128xf32, #tpu.memory_space<vmem>>, vector<16x128xf32>
      %c0_32 = arith.constant 0 : index
      %c0_33 = arith.constant 0 : index
      %68 = vector.load %arg8[%c0_32, %c0_33] : memref<16x128xf32, #tpu.memory_space<vmem>>, vector<16x128xf32>
      tpu.vector_store %arg8[%c0_32, %c0_33], %67 {strides = array<i32>} : memref<16x128xf32, #tpu.memory_space<vmem>>, vector<16x128xf32>,
    } else {
    }
    %c0 = arith.constant 0 : index
    %c0_1 = arith.constant 0 : index
    %3 = vector.load %arg8[%c0, %c0_1] : memref<16x128xf32, #tpu.memory_space<vmem>>, vector<16x128xf32>
    %4 = tpu.iota {dimensions = array<i32: 0>} : vector<16x1xi32>
    %c16_i32 = arith.constant 16 : i32
    %5 = vector.broadcast %c16_i32 : i32 to vector<16x1xi32>
    %6 = arith.cmpi slt, %4, %5 : vector<16x1xi32>
    %7 = arith.extui %6 : vector<16x1xi1> to vector<16x1xi32>
    %8 = arith.sitofp %7 : vector<16x1xi32> to vector<16x1xf32>
    %c0_2 = arith.constant 0 : index
    %c0_3 = arith.constant 0 : index
    %9 = vector.load %arg2[%c0_2, %c0_3] : memref<16x16xbf16, #tpu.memory_space<vmem>>, vector<16x16xbf16>
    %10 = arith.truncf %3 : vector<16x128xf32> to vector<16x128xbf16>
    %cst = arith.constant dense<0.000000e+00> : vector<16x128xf32>
    %11 = tpu.matmul %9, %10, %cst {dimension_numbers = #tpu.dot_dimension_numbers<[1], [0], [0], [1], [0, 0, 1, 1], [], []>} : vector<16x16xbf16>, vector<16x128xbf16>, vector<16x128xf32> -> vector<16x128xf32>
    %c0_4 = arith.constant 0 : index
    %c0_5 = arith.constant 0 : index
    %12 = vector.load %arg3[%c0_4, %c0_5] : memref<16x18xbf16, #tpu.memory_space<vmem>>, vector<16x18xbf16>
    %c0_6 = arith.constant 0 : index
    %c0_7 = arith.constant 0 : index
    %c0_8 = arith.constant 0 : index
    %13 = vector.load %arg4[%c0_6, %c0_7, %c0_8] : memref<1x18x128xbf16, #tpu.memory_space<vmem>>, vector<1x18x128xbf16>
    %14 = vector.shape_cast %13 : vector<1x18x128xbf16> to vector<18x128xbf16>
    %cst_9 = arith.constant dense<0.000000e+00> : vector<16x128xf32>
    %15 = tpu.matmul %12, %14, %cst_9 {dimension_numbers = #tpu.dot_dimension_numbers<[1], [0], [0], [1], [0, 0, 1, 1], [], []>} : vector<16x18xbf16>, vector<18x128xbf16>, vector<16x128xf32> -> vector<16x128xf32>
    %16 = arith.addf %11, %15 : vector<16x128xf32>
    %c0_10 = arith.constant 0 : index
    %c0_11 = arith.constant 0 : index
    %c0_12 = arith.constant 0 : index
    %17 = vector.load %arg7[%c0_10, %c0_11, %c0_12] : memref<1x4x128xf32, #tpu.memory_space<vmem>>, vector<1x4x128xf32>
    %18 = vector.shape_cast %17 : vector<1x4x128xf32> to vector<4x128xf32>
    %19 = vector.extract_strided_slice %18 {offsets = [0, 0], sizes = [1, 128], strides = [1, 1]} : vector<4x128xf32> to vector<1x128xf32>
    %20 = vector.extract_strided_slice %18 {offsets = [1, 0], sizes = [1, 128], strides = [1, 1]} : vector<4x128xf32> to vector<1x128xf32>
    %21 = vector.extract_strided_slice %18 {offsets = [2, 0], sizes = [1, 128], strides = [1, 1]} : vector<4x128xf32> to vector<1x128xf32>
    %22 = vector.extract_strided_slice %18 {offsets = [3, 0], sizes = [1, 128], strides = [1, 1]} : vector<4x128xf32> to vector<1x128xf32>
    %23 = arith.truncf %16 : vector<16x128xf32> to vector<16x128xbf16>
    %c0_13 = arith.constant 0 : index
    %c0_14 = arith.constant 0 : index
    %c0_15 = arith.constant 0 : index
    %24 = vector.load %arg5[%c0_13, %c0_14, %c0_15] : memref<1x128x128xbf16, #tpu.memory_space<vmem>>, vector<1x128x128xbf16>
    %25 = vector.shape_cast %24 : vector<1x128x128xbf16> to vector<128x128xbf16>
    %cst_16 = arith.constant dense<0.000000e+00> : vector<16x128xf32>
    %26 = tpu.matmul %23, %25, %cst_16 {dimension_numbers = #tpu.dot_dimension_numbers<[1], [0], [0], [1], [0, 0, 1, 1], [], []>} : vector<16x128xbf16>, vector<128x128xbf16>, vector<16x128xf32> -> vector<16x128xf32>
    %27 = vector.broadcast %19 : vector<1x128xf32> to vector<16x128xf32>
    %28 = arith.addf %26, %27 : vector<16x128xf32>
    %cst_17 = arith.constant 0.000000e+00 : f32
    %29 = vector.broadcast %cst_17 : f32 to vector<16x128xf32>
    %30 = arith.maximumf %28, %29 : vector<16x128xf32>
    %31 = arith.truncf %30 : vector<16x128xf32> to vector<16x128xbf16>
    %c0_18 = arith.constant 0 : index
    %c0_19 = arith.constant 0 : index
    %c0_20 = arith.constant 0 : index
    %32 = vector.load %arg6[%c0_18, %c0_19, %c0_20] : memref<1x128x128xbf16, #tpu.memory_space<vmem>>, vector<1x128x128xbf16>
    %33 = vector.shape_cast %32 : vector<1x128x128xbf16> to vector<128x128xbf16>
    %cst_21 = arith.constant dense<0.000000e+00> : vector<16x128xf32>
    %34 = tpu.matmul %31, %33, %cst_21 {dimension_numbers = #tpu.dot_dimension_numbers<[1], [0], [0], [1], [0, 0, 1, 1], [], []>} : vector<16x128xbf16>, vector<128x128xbf16>, vector<16x128xf32> -> vector<16x128xf32>
    %35 = vector.broadcast %20 : vector<1x128xf32> to vector<16x128xf32>
    %36 = arith.addf %34, %35 : vector<16x128xf32>
    %37 = vector.broadcast %8 : vector<16x1xf32> to vector<16x128xf32>
    %38 = arith.mulf %36, %37 : vector<16x128xf32>
    %cst_22 = arith.constant dense<0.000000e+00> : vector<128xf32>
    %39 = vector.multi_reduction <add>, %38, %cst_22 [0] : vector<16x128xf32> to vector<128xf32>
    %40 = vector.shape_cast %39 : vector<128xf32> to vector<1x128xf32>
    %cst_23 = arith.constant 6.250000e-02 : f32
    %41 = vector.broadcast %cst_23 : f32 to vector<1x128xf32>
    %42 = arith.mulf %40, %41 : vector<1x128xf32>
    %43 = arith.mulf %38, %36 : vector<16x128xf32>
    %cst_24 = arith.constant dense<0.000000e+00> : vector<128xf32>
    %44 = vector.multi_reduction <add>, %43, %cst_24 [0] : vector<16x128xf32> to vector<128xf32>
    %45 = vector.shape_cast %44 : vector<128xf32> to vector<1x128xf32>
    %cst_25 = arith.constant 6.250000e-02 : f32
    %46 = vector.broadcast %cst_25 : f32 to vector<1x128xf32>
    %47 = arith.mulf %45, %46 : vector<1x128xf32>
    %48 = arith.mulf %42, %42 : vector<1x128xf32>
    %49 = arith.subf %47, %48 : vector<1x128xf32>
    %50 = vector.broadcast %42 : vector<1x128xf32> to vector<16x128xf32>
    %51 = arith.subf %36, %50 : vector<16x128xf32>
    %cst_26 = arith.constant 9.99999974E-6 : f32
    %52 = vector.broadcast %cst_26 : f32 to vector<1x128xf32>
    %53 = arith.addf %49, %52 : vector<1x128xf32>
    %54 = math.rsqrt %53 : vector<1x128xf32>
    %55 = vector.broadcast %54 : vector<1x128xf32> to vector<16x128xf32>
    %56 = arith.mulf %51, %55 : vector<16x128xf32>
    %57 = vector.broadcast %21 : vector<1x128xf32> to vector<16x128xf32>
    %58 = arith.mulf %56, %57 : vector<16x128xf32>
    %59 = vector.broadcast %22 : vector<1x128xf32> to vector<16x128xf32>
    %60 = arith.addf %58, %59 : vector<16x128xf32>
    %61 = vector.broadcast %8 : vector<16x1xf32> to vector<16x128xf32>
    %62 = arith.mulf %60, %61 : vector<16x128xf32>
    %c0_27 = arith.constant 0 : index
    %c0_28 = arith.constant 0 : index
    %63 = vector.load %arg8[%c0_27, %c0_28] : memref<16x128xf32, #tpu.memory_space<vmem>>, vector<16x128xf32>
    tpu.vector_store %arg8[%c0_27, %c0_28], %62 {strides = array<i32>} : memref<16x128xf32, #tpu.memory_space<vmem>>, vector<16x128xf32>,
    %c1_i32 = arith.constant 1 : i32
    %64 = arith.cmpi ne, %arg0, %c1_i32 : i32
    %65 = arith.extui %64 : i1 to i32
    %c0_i32_29 = arith.constant 0 : i32
    %66 = arith.cmpi ne, %65, %c0_i32_29 : i32
    scf.if %66 {
      %c0_30 = arith.constant 0 : index
      %c0_31 = arith.constant 0 : index
      %67 = vector.load %arg8[%c0_30, %c0_31] : memref<16x128xf32, #tpu.memory_space<vmem>>, vector<16x128xf32>
      %cst_32 = arith.constant 0.000000e+00 : f32
      %68 = vector.broadcast %cst_32 : f32 to vector<16x128xf32>
      %69 = arith.maximumf %67, %68 : vector<16x128xf32>
      %c0_33 = arith.constant 0 : index
      %c0_34 = arith.constant 0 : index
      %70 = vector.load %arg8[%c0_33, %c0_34] : memref<16x128xf32, #tpu.memory_space<vmem>>, vector<16x128xf32>
      tpu.vector_store %arg8[%c0_33, %c0_34], %69 {strides = array<i32>} : memref<16x128xf32, #tpu.memory_space<vmem>>, vector<16x128xf32>,
    } else {
    }
    return
  }
  func.func @transform_0(%arg0: i32) -> (i32, i32) {
    %c0_i32 = arith.constant 0 : i32
    %c0_i32_0 = arith.constant 0 : i32
    %c0_i32_1 = arith.constant 0 : i32
    return %c0_i32, %c0_i32_0 : i32, i32
  }
  func.func @transform_1(%arg0: i32) -> (i32, i32) {
    %c0_i32 = arith.constant 0 : i32
    %c0_i32_0 = arith.constant 0 : i32
    %c0_i32_1 = arith.constant 0 : i32
    return %c0_i32, %c0_i32_0 : i32, i32
  }
  func.func @transform_2(%arg0: i32) -> (i32, i32) {
    %c0_i32 = arith.constant 0 : i32
    %c0_i32_0 = arith.constant 0 : i32
    %c0_i32_1 = arith.constant 0 : i32
    return %c0_i32, %c0_i32_0 : i32, i32
  }
  func.func @transform_3(%arg0: i32) -> (i32, i32, i32) {
    %c0_i32 = arith.constant 0 : i32
    %c0_i32_0 = arith.constant 0 : i32
    %c0_i32_1 = arith.constant 0 : i32
    return %arg0, %c0_i32, %c0_i32_0 : i32, i32, i32
  }
  func.func @transform_4(%arg0: i32) -> (i32, i32, i32) {
    %c0_i32 = arith.constant 0 : i32
    %c0_i32_0 = arith.constant 0 : i32
    %c0_i32_1 = arith.constant 0 : i32
    return %arg0, %c0_i32, %c0_i32_0 : i32, i32, i32
  }
  func.func @transform_5(%arg0: i32) -> (i32, i32, i32) {
    %c0_i32 = arith.constant 0 : i32
    %c0_i32_0 = arith.constant 0 : i32
    %c0_i32_1 = arith.constant 0 : i32
    return %arg0, %c0_i32, %c0_i32_0 : i32, i32, i32
  }
  func.func @transform_6(%arg0: i32) -> (i32, i32, i32) {
    %c0_i32 = arith.constant 0 : i32
    %c0_i32_0 = arith.constant 0 : i32
    %c0_i32_1 = arith.constant 0 : i32
    return %arg0, %c0_i32, %c0_i32_0 : i32, i32, i32
  }
  func.func @transform_7(%arg0: i32) -> (i32, i32) {
    %c0_i32 = arith.constant 0 : i32
    %c0_i32_0 = arith.constant 0 : i32
    %c0_i32_1 = arith.constant 0 : i32
    return %c0_i32, %c0_i32_0 : i32, i32
  }
}

</mosaic_0001>

<bundles_post_ra>
// kernel: tpu_custom_call.1
= control target key start
LH: loop header
LB: loop body
LE: loop exit
PB: predicated region body
PF: predicated region fallthrough
CT: control target
= control target key end

     0   :  { %12 = vsyncpa [#allocation3], 0  ;;  %s1527_s0 = inlined_call_operand.vmem [shape: f32[16,128], index: 0, kind: input, shape index: {}]   ;;  %s1528_s1 = inlined_call_operand.vmem [shape: bf16[16,16], index: 1, kind: input, shape index: {}]   ;;  %s1529_s2 = inlined_call_operand.vmem [shape: bf16[16,18], index: 2, kind: input, shape index: {}]   ;;  %s1530_s3 = inlined_call_operand.vmem [shape: bf16[2,18,128], index: 3, kind: input, shape index: {}]   ;;  %s1531_s4 = inlined_call_operand.hbm [shape: bf16[2,128,128], index: 4, kind: input, shape index: {}]   ;;  %s1532_s5 = inlined_call_operand.hbm [shape: bf16[2,128,128], index: 5, kind: input, shape index: {}]   ;;  %s1533_s6 = inlined_call_operand.vmem [shape: f32[2,4,128], index: 6, kind: input, shape index: {}]   ;;  %s1534_s7 = inlined_call_operand.hbm [shape: f32[16,128], index: 7, kind: output, shape index: {}]  }
   0x1   :  { %14 = vsyncpa [#allocation3 + $0x1], 0 }
   0x2   :  { %15 = vsyncpa [#allocation6], 0 }
   0x3   :  { %17 = vsyncpa [#allocation6 + $0x1], 0 }
   0x4   :  { %18 = vsyncpa [#allocation4], 0  ;;  %s1268_s24 = smov 0   ;;  %s1270_s25 = smov 0  }
   0x5   :  { %s1272_s26 = smov 0   ;;  %s1274_s27 = smov 0  }
   0x6 LB: > { %s1287_s28 = sadd.s32 4294967295, %s1217_s27   ;;  %s1290_s29 = sadd.s32 1, %s1217_s27   ;;  %s1217_s27 = sphi %s1274_s27, %s1544_s27   ;;  %s1213_s26 = sphi %s1272_s26, %s1543_s26   ;;  %s1209_s25 = sphi %s1270_s25, %s1542_s25   ;;  %s1205_s24 = sphi %s1268_s24, %s1541_s24  }
   0x7   : > { %s117_s30 = ssub.s32 %s1217_s27, %s1290_s29  ;;  %s120_s8 = sadd.s32 1, %s1213_s26 }
   0x8   : > { %p118_p0 = scmp.eq.s32.totalorder %s117_s30, 0  ;;  %p127_p1 = scmp.ne.s32.totalorder %s1213_s26, %s1209_s25 }
   0x9   : > { %p128_p2 = scmp.eq.s32.totalorder %s1217_s27, 0  ;;  %p133_p3 = scmp.ne.s32.totalorder %s1209_s25, %s1205_s24 }
   0xa   : > { %s1300_s9 = scalar_select %p118_p0, %s1213_s26, %s120_s8  }
   0xb   : > { %p129_p4 = por %p128_p2, %p127_p1  ;;  %p134_p5 = scmp.eq.s32.totalorder %s1287_s28, 0 }
   0xc   : > { %p1025_p6 = scmp.lt.s32.totalorder %s1217_s27, 2  ;;  %s1309_s11 = sand.u32 1, %s1213_s26  }
   0xd   : > { %p1304_p7 = por %p134_p5, %p133_p3  ;;  %s889_s12 = sshll.u32 %s1309_s11, 6 }
   0xe   : > { %s928_s13 = sshll.u32 %s1217_s27, 10  ;;  %s251_s17 = scalar_lea.vmem [#allocation2], %s889_s12 }
   0xf   : > { %s1536_s10 = scalar_select %p1304_p7, 1, 0 }
  0x10   : > { %s1318_s16 = scalar_lea.hbm %s1531_s4, %s928_s13  ;;  %s258_s18 = sshll.u32 %s251_s17, 4  ;;  %s1322_s18 = int_to_ptr.vmem [resolvable:$true] %s258_s18 }
  0x11   : > { %p1324_p8 = pnand %p1025_p6, %p129_p4  ;;  %s248_s20 = scalar_lea.sflag [#allocation3], %s1309_s11 }
  0x12   : > { %s1089_s21 = scalar_lea.hbm %s1318_s16, 1024  ;;  %s1094_s24 = scalar_lea.hbm %s1531_s4, 2048 }
  0x13   : > { %p1090_p10 = scmp.ne.s32.totalorder %s1318_s16, %s1089_s21  ;;  %p1091_p11 = pneg %p1324_p8 }
  0x14   : > { %p1095_p0 = scmp.lt.u32.totalorder %s1318_s16, %s1531_s4  ;;  %p1096_p1 = scmp.lt.u32.totalorder %s1094_s24, %s1089_s21 }
  0x15   : > { %p1092_p12 = pnand %p1091_p11, %p1090_p10  ;;  %p1098_p3 = scmp.lt.u32.totalorder %s1089_s21, %s1318_s16 }
  0x16   : > { %p1097_p2 = por %p1096_p1, %p1095_p0 }
  0x17   : > { %p1093_p13 = pneg %p1092_p12 }
  0x18   : > { %p1099_p4 = por %p1098_p3, %p1097_p2 }
  0x1a   : > { %p1100_p5 = pnand %p1099_p4, %p1093_p13 }
  0x1c   : > { %1103 = shalt.err (!%p1100_p5)
}
  0x1d   : > { %s1104_s14 = scalar_lea.vmem %s1322_s18, 1024  ;;  %s1219_s15 = smov [#allocation2]  }
  0x1e   : > { %p1105_p6 = scmp.ne.s32.totalorder %s1322_s18, %s1104_s14  ;;  %s1109_s17 = sshll.u32 %s1219_s15, 4  ;;  %s1110_s17 = int_to_ptr.vmem [resolvable:$false] %s1109_s17 }
  0x1f   : > { %s1111_s22 = scalar_lea.vmem %s1110_s17, 2048  ;;  %p1112_p9 = scmp.lt.s32.totalorder %s1322_s18, %s1110_s17 }
  0x20   : > { %p1107_p10 = pnand %p1105_p6, %p1091_p11  ;;  %p1113_p0 = scmp.lt.s32.totalorder %s1111_s22, %s1104_s14 }
  0x22   : > { %p1108_p12 = pneg %p1107_p10  ;;  %p1114_p1 = por %p1113_p0, %p1112_p9 }
  0x24   : > { %p1115_p2 = pnand %p1114_p1, %p1108_p12 }
  0x26   : > { %1118 = shalt.err (!%p1115_p2)
}
  0x27   : > { %s1220_s21 = smov 64   ;;  %s1221_s23 = smov 4  }
  0x28   : > { %1021 = dma.hbm_to_vmem [thread:$0]  (!%p1324_p8), %s1318_s16, 1024, %s1322_s18, %s248_s20, %s1220_s21, %s1220_s21, %s1221_s23  }
  0x29   : > { %p294_p9 = scmp.lt.s32.totalorder %s1217_s27, 3  ;;  %s1366_s8 = scalar_lea.hbm %s1532_s5, %s928_s13 }
  0x2a   : > { %p1538_p13 = scmp.ge.s32.totalorder %s1217_s27, 1  ;;  %s272_s15 = scalar_lea.vmem [#allocation5], %s889_s12 }
  0x2b   : > { %s279_s17 = sshll.u32 %s272_s15, 4  ;;  %s269_s16 = scalar_lea.sflag [#allocation6], %s1309_s11  ;;  %s1376_s17 = int_to_ptr.vmem [resolvable:$true] %s279_s17 }
  0x2c   : > { %p1370_p3 = pnand %p1538_p13, %p294_p9  ;;  %s1119_s18 = scalar_lea.hbm %s1366_s8, 1024 }
  0x2d   : > { %p1120_p4 = scmp.ne.s32.totalorder %s1366_s8, %s1119_s18  ;;  %s1124_s20 = scalar_lea.hbm %s1532_s5, 2048 }
  0x2e   : > { %p1125_p10 = scmp.lt.u32.totalorder %s1366_s8, %s1532_s5  ;;  %p1126_p12 = scmp.lt.u32.totalorder %s1124_s20, %s1119_s18 }
  0x2f   : > { %p1122_p5 = pnand %p1120_p4, %p1091_p11  ;;  %p1128_p1 = scmp.lt.u32.totalorder %s1119_s18, %s1366_s8 }
  0x30   : > { %p1127_p0 = por %p1126_p12, %p1125_p10 }
  0x31   : > { %p1123_p6 = pneg %p1122_p5 }
  0x32   : > { %p1129_p2 = por %p1128_p1, %p1127_p0 }
  0x34   : > { %p1130_p9 = pnand %p1129_p2, %p1123_p6 }
  0x36   : > { %1133 = shalt.err (!%p1130_p9)
}
  0x37   : > { %s1134_s12 = scalar_lea.vmem %s1376_s17, 1024  ;;  %s1222_s30 = smov [#allocation5]  }
  0x38   : > { %p1135_p13 = scmp.ne.s32.totalorder %s1376_s17, %s1134_s12  ;;  %s1139_s15 = sshll.u32 %s1222_s30, 4  ;;  %s1140_s15 = int_to_ptr.vmem [resolvable:$false] %s1139_s15 }
  0x39   : > { %s1141_s27 = scalar_lea.vmem %s1140_s15, 2048  ;;  %p1142_p7 = scmp.lt.s32.totalorder %s1376_s17, %s1140_s15 }
  0x3a   : > { %p1137_p4 = pnand %p1135_p13, %p1091_p11  ;;  %p1143_p10 = scmp.lt.s32.totalorder %s1141_s27, %s1134_s12 }
  0x3c   : > { %p1138_p5 = pneg %p1137_p4  ;;  %p1144_p12 = por %p1143_p10, %p1142_p7 }
  0x3e   : > { %p1145_p0 = pnand %p1144_p12, %p1138_p5 }
  0x40   : > { %1148 = shalt.err (!%p1145_p0)
}
  0x41   : > { %1024 = dma.hbm_to_vmem [thread:$0]  (!%p1324_p8), %s1366_s8, 1024, %s1376_s17, %s269_s16, %s1220_s21, %s1220_s21, %s1221_s23  }
  0x42   : > { %298 = sbr.rel (%p1370_p3) target bundleno = 825 (0x339), region = 48  ;;  %s300_s18 = sand.u32 (!%p1370_p3), 1, %s1209_s25  }
  0x43   : > { %s896_s13 = sshll.u32 (!%p1370_p3), %s300_s18, 6  ;;  %s301_s20 = scalar_lea.sflag (!%p1370_p3), [#allocation3], %s300_s18 }
  0x44   : > { %s1410_s22 = scalar_lea.vmem (!%p1370_p3), [#allocation2], %s896_s13  ;;  %p1540_p7 = scmp.ne.s32.totalorder (!%p1370_p3), %s1536_s10, 0 }
  0x49   : > { %1192 = dma.done.wait (%p1540_p7), %s301_s20, 1024  }
  0x4a   : > { %1194 = vsyncadd (%p1540_p7), %s301_s20, 4294966272  ;;  %s310_s11 = scalar_lea.sflag [#allocation6], %s300_s18  ;;  %s1416_s19 = scalar_lea.vmem [#allocation5], %s896_s13 }
  0x4b   : > { %1196 = dma.done.wait (%p1540_p7), %s310_s11, 1024  }
  0x4c   : > { %1198 = vsyncadd (%p1540_p7), %s310_s11, 4294966272  ;;  %p353_p8 = scmp.lt.s32.totalorder %s1287_s28, 1  ;;  %p900_p11 = scmp.ne.s32.totalorder %s1287_s28, 0 }
  0x4d   : > { %v367_v0 = vld [vmem:[%s1527_s0] sm:$0xff] (!%p900_p11)  ;;  %v368_v1 = vld [vmem:[%s1527_s0 + $0x8] sm:$0xff] (!%p900_p11) }
  0x4e   : > { %s354_s21 = scalar_select %p353_p8, %s1287_s28, 1 }
  0x4f   : > { %366 = sbr.rel (%p900_p11) target bundleno = 86 (0x56), region = 60  ;;  %369 = vst [vmem:[#allocation7] sm:$0xff] (!%p900_p11), %v367_v0  ;;  %370 = vst [vmem:[#allocation7 + $0x8] sm:$0xff] (!%p900_p11), %v368_v1 }
  0x50   : > { %s1009_s23 = smul.u32 12, %s354_s21  ;;  %s899_s8 = sshll.u32 %s354_s21, 2 }
  0x51   : > { %s1427_s16 = scalar_lea.vmem %s1533_s6, %s899_s8 }
  0x52   : > { %s357_s30 = scalar_lea.vmem %s1530_s3, %s1009_s23 }
  0x56 PF: > { %v1067_v2 = vld [vmem:[%s357_s30] sm:$0xff]   ;;  %v1223_v3 = vmov 0.0   ;;  %v372_v5 = vld [vmem:[#allocation7 + $0x8] sm:$0xff]  ;;  %vm408_vm0 = vcmask 1040384   ;;  %vm1224_vm1 = vmmov 0   ;;  %vm458_vm2 = vcmask 130048  }
  0x57   : > { %953 = vmatprep.subr.bf16.mxu1 %v1223_v3  ;;  %961 = vmatprep.subr.bf16.mxu0 %v1223_v3  ;;  %v371_v4 = vld [vmem:[#allocation7] sm:$0xff]  ;;  %v1068_v7 = vld [vmem:[%s357_s30 + $0x8] ss:$0 sps:$4 sm:$0x11]   ;;  %vm404_vm3 = vcmask 146432   ;;  %v1073_v13 = vld [vmem:[%s1410_s22 + $0x10] sm:$0xff]   ;;  %v521_v38 = vlaneseq }
  0x58   : > { %954 = vmatpush3.bf16.msra.mxu1 %v1067_v2  ;;  %v384_v6 = vpack.c.bf16 %v372_v5, %v371_v4  ;;  %963 = vmatprep.mubr.msk.bf16.mxu0 %vm1224_vm1, %v1223_v3  ;;  %v1069_v8 = vld [vmem:[%s1528_s1] sm:$0xff]   ;;  %v410_v9 = vsel %vm408_vm0, %v1068_v7, 0  ;;  %v1072_v12 = vld [vmem:[%s1410_s22 + $0x8] sm:$0xff]   ;;  %v1074_v14 = vld [vmem:[%s1410_s22 + $0x18] sm:$0xff]   ;;  %p923_p3 = scmp.eq.s32.totalorder %s1287_s28, 1 }
  0x59   : > { %955 = vmatprep.subr.bf16.mxu1 %v1223_v3  ;;  %957 = vmatprep.mubr.msk.bf16.mxu1 %vm1224_vm1, %v1223_v3  ;;  %v1070_v10 = vld [vmem:[%s1529_s2] sm:$0xff]   ;;  %v1076_v16 = vld [vmem:[%s1410_s22 + $0x28] sm:$0xff]   ;;  %v1077_v17 = vld [vmem:[%s1410_s22 + $0x30] sm:$0xff]   ;;  %v522_v39 = vshrl.u32 %v521_v38, 7 }
  0x5a   : > { %962 = vmatpush3.bf16.msra.mxu0 %v384_v6  ;;  %v1071_v11 = vld [vmem:[%s1410_s22] sm:$0xff]   ;;  %v1078_v18 = vld [vmem:[%s1410_s22 + $0x38] sm:$0xff]   ;;  %v1080_v20 = vld [vmem:[%s1416_s19 + $0x8] sm:$0xff]  }
  0x5b   : > { %987 = vmatprep.subr.bf16.mxu0 %v1223_v3  ;;  %v1075_v15 = vld [vmem:[%s1410_s22 + $0x20] sm:$0xff]   ;;  %v1081_v21 = vld [vmem:[%s1416_s19 + $0x10] sm:$0xff]   ;;  %v1082_v22 = vld [vmem:[%s1416_s19 + $0x18] sm:$0xff]   ;;  %v523_v40 = vsub.s32 0, %v522_v39  ;;  %v635_v52 = vsub.s32 1, %v522_v39 }
  0x5c   : > { %956 = vmatpush3.bf16.msra.mxu1 %v410_v9  ;;  %v1079_v19 = vld [vmem:[%s1416_s19] sm:$0xff]   ;;  %v1084_v24 = vld [vmem:[%s1416_s19 + $0x28] sm:$0xff]   ;;  %v1085_v36 = vld [vmem:[%s1416_s19 + $0x30] sm:$0xff]  }
  0x5d   : > { %964 = vmatmul.mubr.msk.bf16.vlgmr.msra.gmra.mrb[0].mxu0 %vm458_vm2, %v1069_v8  ;;  %967 = vmatprep.subr.bf16.mxu1 %v1223_v3  ;;  %v1083_v23 = vld [vmem:[%s1416_s19 + $0x20] sm:$0xff]   ;;  %v1086_v37 = vld [vmem:[%s1416_s19 + $0x38] sm:$0xff]  }
  0x5e   : > { %1003 = vmatprep.mubr.msk.bf16.mxu0 %vm1224_vm1, %v1223_v3  ;;  %988 = vmatpush3.bf16.msra.mxu0 %v1079_v19  ;;  %v503_v41 = vld [vmem:[%s1427_s16] sm:$0xf]  ;;  %v756_v19 = vsub.s32 2, %v522_v39 }
  0x5f   : > { %958 = vmatmul.mubr.msk.bf16.vlgmr.msra.gmra.mrb[0].mxu1 %vm404_vm3, %v1070_v10  ;;  %989 = vmatprep.subr.bf16.mxu0 %v1223_v3  ;;  %v524_v42 = vrot.slane %v503_v41, %v523_v40  ;;  %v636_v53 = vrot.slane %v503_v41, %v635_v52 }
  0x60   : > { %968 = vmatpush3.bf16.msra.mxu1 %v1071_v11  ;;  %983 = vmatprep.mubr.msk.bf16.mxu1 %vm1224_vm1, %v1223_v3 }
  0x61   : > { %969 = vmatprep.subr.bf16.mxu1 %v1223_v3 }
  0x62   : > { %990 = vmatpush3.bf16.msra.mxu0 %v1080_v20  ;;  %v762_v20 = vsub.s32 3, %v522_v39 }
  0x63   : > { %991 = vmatprep.subr.bf16.mxu0 %v1223_v3 }
  0x64   : > { %970 = vmatpush3.bf16.msra.mxu1 %v1072_v12 }
  0x65   : > { %971 = vmatprep.subr.bf16.mxu1 %v1223_v3 }
  0x66   : > { %992 = vmatpush3.bf16.msra.mxu0 %v1081_v21  ;;  %v757_v21 = vrot.slane %v503_v41, %v756_v19 }
  0x67   : > { %993 = vmatprep.subr.bf16.mxu0 %v1223_v3 }
  0x68   : > { %972 = vmatpush3.bf16.msra.mxu1 %v1073_v13 }
  0x69   : > { %973 = vmatprep.subr.bf16.mxu1 %v1223_v3 }
  0x6a   : > { %994 = vmatpush3.bf16.msra.mxu0 %v1082_v22 }
  0x6b   : > { %995 = vmatprep.subr.bf16.mxu0 %v1223_v3 }
  0x6c   : > { %974 = vmatpush3.bf16.msra.mxu1 %v1074_v14 }
  0x6d   : > { %975 = vmatprep.subr.bf16.mxu1 %v1223_v3 }
  0x6e   : > { %996 = vmatpush3.bf16.msra.mxu0 %v1083_v23  ;;  %v763_v23 = vrot.slane %v503_v41, %v762_v20 }
  0x6f   : > { %997 = vmatprep.subr.bf16.mxu0 %v1223_v3 }
  0x70   : > { %976 = vmatpush3.bf16.msra.mxu1 %v1075_v15 }
  0x71   : > { %977 = vmatprep.subr.bf16.mxu1 %v1223_v3 }
  0x72   : > { %998 = vmatpush3.bf16.msra.mxu0 %v1084_v24 }
  0x73   : > { %999 = vmatprep.subr.bf16.mxu0 %v1223_v3 }
  0x74   : > { %978 = vmatpush3.bf16.msra.mxu1 %v1076_v16 }
  0x75   : > { %979 = vmatprep.subr.bf16.mxu1 %v1223_v3 }
  0x76   : > { %1000 = vmatpush3.bf16.msra.mxu0 %v1085_v36 }
  0x77   : > { %1001 = vmatprep.subr.bf16.mxu0 %v1223_v3 }
  0x78   : > { %980 = vmatpush3.bf16.msra.mxu1 %v1077_v17 }
  0x79   : > { %981 = vmatprep.subr.bf16.mxu1 %v1223_v3 }
  0x7a   : > { %1002 = vmatpush3.bf16.msra.mxu0 %v1086_v37 }
  0x7c   : > { %982 = vmatpush3.bf16.msra.mxu1 %v1078_v18 }
 0x130   : > { %v496_v25 = vpop.f32.mrb[0].mxu0 }
 0x131   : > { %v965_v26 = vpop.f32.mrb[1].mxu0 }
 0x132   : > { %v499_v27 = vpop.f32.mrb[2].mxu0  ;;  %v446_v28 = vpop.f32.mrb[0].mxu1 }
 0x133   : > { %v497_v29 = vadd.f32 %v496_v25, %v446_v28  ;;  %v966_v30 = vpop.f32.mrb[3].mxu0  ;;  %v959_v31 = vpop.f32.mrb[1].mxu1 }
 0x134   : > { %v449_v32 = vpop.f32.mrb[2].mxu1 }
 0x135   : > { %v500_v33 = vadd.f32 %v499_v27, %v449_v32  ;;  %v960_v34 = vpop.f32.mrb[3].mxu1 }
 0x137   : > { %v504_v35 = vpack.c.bf16 %v500_v33, %v497_v29 }
 0x139   : > { %984 = vmatmul.mubr.bf16.vlgmr.msra.gmra.mrb[4].mxu1 %v504_v35 }
 0x20c   : > { %v607_v43 = vpop.f32.mrb[4].mxu1 }
 0x20d   : > { %v608_v44 = vadd.f32 %v607_v43, %v524_v42  ;;  %v985_v45 = vpop.f32.mrb[5].mxu1 }
 0x20e   : > { %v610_v46 = vpop.f32.mrb[6].mxu1 }
 0x20f   : > { %v611_v47 = vadd.f32 %v610_v46, %v524_v42  ;;  %v986_v48 = vpop.f32.mrb[7].mxu1  ;;  %v614_v49 = vmax.f32 %v608_v44, 0.0 }
 0x211   : > { %v615_v50 = vmax.f32 %v611_v47, 0.0 }
 0x213   : > { %v616_v51 = vpack.c.bf16 %v615_v50, %v614_v49 }
 0x215   : > { %1004 = vmatmul.mubr.bf16.vlgmr.msra.gmra.mrb[4].mxu0 %v616_v51 }
 0x2e8   : > { %v719_v54 = vpop.f32.mrb[4].mxu0 }
 0x2e9   : > { %v720_v55 = vadd.f32 %v719_v54, %v636_v53  ;;  %v1005_v56 = vpop.f32.mrb[5].mxu0 }
 0x2ea   : > { %v722_v57 = vpop.f32.mrb[6].mxu0 }
 0x2eb   : > { %v723_v58 = vadd.f32 %v722_v57, %v636_v53  ;;  %v1006_v59 = vpop.f32.mrb[7].mxu0  ;;  %v736_v60 = vmul.f32 %v720_v55, %v720_v55 }
 0x2ed   : > { %v728_v61 = vadd.f32 %v723_v58, %v720_v55  ;;  %v737_v62 = vmul.f32 %v723_v58, %v723_v58 }
 0x2ef   : > { %v729_v63 = vrot.slane %v728_v61, 4  ;;  %v738_v0 = vadd.f32 %v737_v62, %v736_v60 }
 0x2f1   : > { %v730_v1 = vadd.f32 %v729_v63, %v728_v61  ;;  %v739_v2 = vrot.slane %v738_v0, 4 }
 0x2f3   : > { %v731_v3 = vrot.slane %v730_v1, 2  ;;  %v740_v4 = vadd.f32 %v739_v2, %v738_v0 }
 0x2f5   : > { %v732_v5 = vadd.f32 %v731_v3, %v730_v1  ;;  %v741_v6 = vrot.slane %v740_v4, 2 }
 0x2f7   : > { %v733_v7 = vrot.slane %v732_v5, 1  ;;  %v742_v8 = vadd.f32 %v741_v6, %v740_v4 }
 0x2f9   : > { %v734_v9 = vadd.f32 %v733_v7, %v732_v5  ;;  %v743_v10 = vrot.slane %v742_v8, 1 }
 0x2fb   : > { %v735_v11 = vmul.f32 0.0625, %v734_v9  ;;  %v744_v12 = vadd.f32 %v743_v10, %v742_v8 }
 0x2fd   : > { %v745_v13 = vmul.f32 0.0625, %v744_v12  ;;  %v746_v14 = vmul.f32 %v735_v11, %v735_v11  ;;  %v748_v15 = vsub.f32 %v720_v55, %v735_v11  ;;  %v749_v16 = vsub.f32 %v723_v58, %v735_v11 }
 0x2ff   : > { %v747_v17 = vsub.f32 %v745_v13, %v746_v14 }
 0x301   : > { %v750_v18 = vadd.f32 1e-05, %v747_v17 }
 0x303   : > { %1087 = vrsqrt.f32 %v750_v18 }
 0x30d   : > { %v1088_v22 = vpop.eup %1087 }
 0x30e   : > { %v752_v24 = vmul.f32 %v1088_v22, %v748_v15  ;;  %v753_v25 = vmul.f32 %v1088_v22, %v749_v16  ;;  %773 = sbr.rel (%p923_p3) target bundleno = 799 (0x31f), region = 64 }
 0x310   : > { %v758_v26 = vmul.f32 %v757_v21, %v752_v24  ;;  %v759_v27 = vmul.f32 %v757_v21, %v753_v25 }
 0x312   : > { %v764_v28 = vadd.f32 %v763_v23, %v758_v26  ;;  %v765_v29 = vadd.f32 %v763_v23, %v759_v27 }
 0x314   : > { %768 = vst [vmem:[#allocation7] sm:$0xff] %v764_v28  ;;  %769 = vst [vmem:[#allocation7 + $0x8] sm:$0xff] %v765_v29 }
 0x31b   : > { %v774_v30 = vld [vmem:[#allocation7] sm:$0xff]  ;;  %v775_v31 = vld [vmem:[#allocation7 + $0x8] sm:$0xff] }
 0x31c   : > { %v776_v32 = vmax.f32 %v774_v30, 0.0  ;;  %v777_v33 = vmax.f32 %v775_v31, 0.0 }
 0x31e   : > { %778 = vst [vmem:[#allocation7] sm:$0xff] %v776_v32  ;;  %779 = vst [vmem:[#allocation7 + $0x8] sm:$0xff] %v777_v33 }
 0x31f PF: > { %s1225_s22 = smov [#allocation7]  }
 0x320   : > { %s786_s19 = sshll.u32 %s1225_s22, 4  ;;  %s787_s19 = int_to_ptr.vmem [resolvable:$true] %s786_s19 }
 0x321   : > { %s1149_s23 = scalar_lea.vmem %s787_s19, 256  ;;  %p1156_p9 = scmp.lt.s32.totalorder %s787_s19, %s787_s19 }
 0x322   : > { %p1150_p6 = scmp.ne.s32.totalorder %s787_s19, %s1149_s23  ;;  %p1157_p13 = scmp.lt.s32.totalorder %s1149_s23, %s1149_s23 }
 0x324   : > { %p1151_p1 = pnand %p1150_p6, %p923_p3  ;;  %p1158_p4 = por %p1157_p13, %p1156_p9 }
 0x326   : > { %p1152_p2 = pneg %p1151_p1 }
 0x328   : > { %p1159_p5 = pnand %p1158_p4, %p1152_p2 }
 0x32a   : > { %1162 = shalt.err (!%p1159_p5)
}
 0x32b   : > { %s1163_s17 = scalar_lea.hbm %s1534_s7, 256 }
 0x32c   : > { %p1164_p10 = scmp.ne.s32.totalorder %s1534_s7, %s1163_s17  ;;  %p1169_p7 = scmp.lt.u32.totalorder %s1163_s17, %s1534_s7 }
 0x32e   : > { %p1165_p12 = pnand %p1164_p10, %p923_p3 }
 0x330   : > { %p1166_p0 = pneg %p1165_p12 }
 0x332   : > { %p1171_p8 = pnand %p1169_p7, %p1166_p0 }
 0x334   : > { %1174 = shalt.err (!%p1171_p8)
}
 0x335   : > { %s1226_s10 = smov 128   ;;  %s1227_s15 = smov 8  }
 0x336   : > { %1015 = dma.vmem_to_hbm [thread:$0]  (%p923_p3), %s787_s19, 256, %s1534_s7, [#allocation4], %s1226_s10, %s1226_s10, %s1227_s15  }
 0x337   : > { %1200 = dma.done.wait (%p923_p3), [#allocation4], 256  }
 0x338   : > { %1202 = vsyncadd (%p923_p3), [#allocation4], 4294967040 }
 0x339 PF: > { %p21_p11 = scmp.ge.s32.totalorder %s1290_s29, 4   ;;  %s1541_s24 = smov %s1209_s25 }
 0x33a   : > { %s1542_s25 = smov %s1213_s26  ;;  %s1543_s26 = smov %s1300_s9 }
 0x33b   : > { %s1544_s27 = smov %s1290_s29  ;;  %23 = sbr.rel (!%p21_p11) target bundleno = 6 (0x6), region = 112 }
 0x342   :  { %802 = vsyncpa [#allocation3], 1 }
 0x343   :  { %804 = vsyncpa [#allocation3 + $0x1], 1 }
 0x344   :  { %805 = vsyncpa [#allocation6], 1 }
 0x345   :  { %807 = vsyncpa [#allocation6 + $0x1], 1 }
 0x346   :  { %808 = vsyncpa [#allocation4], 1 }
 0x347   :  { %810 = vsyncpa [#allocation4 + $0x1], 1 }

// kernel: tpu_custom_call.1
= control target key start
LH: loop header
LB: loop body
LE: loop exit
PB: predicated region body
PF: predicated region fallthrough
CT: control target
= control target key end

     0   :  { %12 = vsyncpa [#allocation3], 0  ;;  %s1527_s0 = inlined_call_operand.vmem [shape: f32[16,128], index: 0, kind: input, shape index: {}]   ;;  %s1528_s1 = inlined_call_operand.vmem [shape: bf16[16,16], index: 1, kind: input, shape index: {}]   ;;  %s1529_s2 = inlined_call_operand.vmem [shape: bf16[16,18], index: 2, kind: input, shape index: {}]   ;;  %s1530_s3 = inlined_call_operand.vmem [shape: bf16[2,18,128], index: 3, kind: input, shape index: {}]   ;;  %s1531_s4 = inlined_call_operand.hbm [shape: bf16[2,128,128], index: 4, kind: input, shape index: {}]   ;;  %s1532_s5 = inlined_call_operand.hbm [shape: bf16[2,128,128], index: 5, kind: input, shape index: {}]   ;;  %s1533_s6 = inlined_call_operand.vmem [shape: f32[2,4,128], index: 6, kind: input, shape index: {}]   ;;  %s1534_s7 = inlined_call_operand.hbm [shape: f32[16,128], index: 7, kind: output, shape index: {}]  }
   0x1   :  { %14 = vsyncpa [#allocation3 + $0x1], 0 }
   0x2   :  { %15 = vsyncpa [#allocation6], 0 }
   0x3   :  { %17 = vsyncpa [#allocation6 + $0x1], 0 }
   0x4   :  { %18 = vsyncpa [#allocation4], 0  ;;  %s1268_s24 = smov 0   ;;  %s1270_s25 = smov 0  }
   0x5   :  { %s1272_s26 = smov 0   ;;  %s1274_s27 = smov 0  }
   0x6 LB: > { %s1287_s28 = sadd.s32 4294967295, %s1217_s27   ;;  %s1290_s29 = sadd.s32 1, %s1217_s27   ;;  %s1217_s27 = sphi %s1274_s27, %s1544_s27   ;;  %s1213_s26 = sphi %s1272_s26, %s1543_s26   ;;  %s1209_s25 = sphi %s1270_s25, %s1542_s25   ;;  %s1205_s24 = sphi %s1268_s24, %s1541_s24  }
   0x7   : > { %s117_s30 = ssub.s32 %s1217_s27, %s1290_s29  ;;  %s120_s8 = sadd.s32 1, %s1213_s26 }
   0x8   : > { %p118_p0 = scmp.eq.s32.totalorder %s117_s30, 0  ;;  %p127_p1 = scmp.ne.s32.totalorder %s1213_s26, %s1209_s25 }
   0x9   : > { %p128_p2 = scmp.eq.s32.totalorder %s1217_s27, 0  ;;  %p133_p3 = scmp.ne.s32.totalorder %s1209_s25, %s1205_s24 }
   0xa   : > { %s1300_s9 = scalar_select %p118_p0, %s1213_s26, %s120_s8  }
   0xb   : > { %p129_p4 = por %p128_p2, %p127_p1  ;;  %p134_p5 = scmp.eq.s32.totalorder %s1287_s28, 0 }
   0xc   : > { %p1025_p6 = scmp.lt.s32.totalorder %s1217_s27, 2  ;;  %s1309_s11 = sand.u32 1, %s1213_s26  }
   0xd   : > { %p1304_p7 = por %p134_p5, %p133_p3  ;;  %s889_s12 = sshll.u32 %s1309_s11, 6 }
   0xe   : > { %s928_s13 = sshll.u32 %s1217_s27, 10  ;;  %s251_s17 = scalar_lea.vmem [#allocation2], %s889_s12 }
   0xf   : > { %s1536_s10 = scalar_select %p1304_p7, 1, 0 }
  0x10   : > { %s1318_s16 = scalar_lea.hbm %s1531_s4, %s928_s13  ;;  %s258_s18 = sshll.u32 %s251_s17, 4  ;;  %s1322_s18 = int_to_ptr.vmem [resolvable:$true] %s258_s18 }
  0x11   : > { %p1324_p8 = pnand %p1025_p6, %p129_p4  ;;  %s248_s20 = scalar_lea.sflag [#allocation3], %s1309_s11 }
  0x12   : > { %s1089_s21 = scalar_lea.hbm %s1318_s16, 1024  ;;  %s1094_s24 = scalar_lea.hbm %s1531_s4, 2048 }
  0x13   : > { %p1090_p10 = scmp.ne.s32.totalorder %s1318_s16, %s1089_s21  ;;  %p1091_p11 = pneg %p1324_p8 }
  0x14   : > { %p1095_p0 = scmp.lt.u32.totalorder %s1318_s16, %s1531_s4  ;;  %p1096_p1 = scmp.lt.u32.totalorder %s1094_s24, %s1089_s21 }
  0x15   : > { %p1092_p12 = pnand %p1091_p11, %p1090_p10  ;;  %p1098_p3 = scmp.lt.u32.totalorder %s1089_s21, %s1318_s16 }
  0x16   : > { %p1097_p2 = por %p1096_p1, %p1095_p0 }
  0x17   : > { %p1093_p13 = pneg %p1092_p12 }
  0x18   : > { %p1099_p4 = por %p1098_p3, %p1097_p2 }
  0x1a   : > { %p1100_p5 = pnand %p1099_p4, %p1093_p13 }
  0x1c   : > { %1103 = shalt.err (!%p1100_p5)
}
  0x1d   : > { %s1104_s14 = scalar_lea.vmem %s1322_s18, 1024  ;;  %s1219_s15 = smov [#allocation2]  }
  0x1e   : > { %p1105_p6 = scmp.ne.s32.totalorder %s1322_s18, %s1104_s14  ;;  %s1109_s17 = sshll.u32 %s1219_s15, 4  ;;  %s1110_s17 = int_to_ptr.vmem [resolvable:$false] %s1109_s17 }
  0x1f   : > { %s1111_s22 = scalar_lea.vmem %s1110_s17, 2048  ;;  %p1112_p9 = scmp.lt.s32.totalorder %s1322_s18, %s1110_s17 }
  0x20   : > { %p1107_p10 = pnand %p1105_p6, %p1091_p11  ;;  %p1113_p0 = scmp.lt.s32.totalorder %s1111_s22, %s1104_s14 }
  0x22   : > { %p1108_p12 = pneg %p1107_p10  ;;  %p1114_p1 = por %p1113_p0, %p1112_p9 }
  0x24   : > { %p1115_p2 = pnand %p1114_p1, %p1108_p12 }
  0x26   : > { %1118 = shalt.err (!%p1115_p2)
}
  0x27   : > { %s1220_s21 = smov 64   ;;  %s1221_s23 = smov 4  }
  0x28   : > { %1021 = dma.hbm_to_vmem [thread:$0]  (!%p1324_p8), %s1318_s16, 1024, %s1322_s18, %s248_s20, %s1220_s21, %s1220_s21, %s1221_s23  }
  0x29   : > { %p294_p9 = scmp.lt.s32.totalorder %s1217_s27, 3  ;;  %s1366_s8 = scalar_lea.hbm %s1532_s5, %s928_s13 }
  0x2a   : > { %p1538_p13 = scmp.ge.s32.totalorder %s1217_s27, 1  ;;  %s272_s15 = scalar_lea.vmem [#allocation5], %s889_s12 }
  0x2b   : > { %s279_s17 = sshll.u32 %s272_s15, 4  ;;  %s269_s16 = scalar_lea.sflag [#allocation6], %s1309_s11  ;;  %s1376_s17 = int_to_ptr.vmem [resolvable:$true] %s279_s17 }
  0x2c   : > { %p1370_p3 = pnand %p1538_p13, %p294_p9  ;;  %s1119_s18 = scalar_lea.hbm %s1366_s8, 1024 }
  0x2d   : > { %p1120_p4 = scmp.ne.s32.totalorder %s1366_s8, %s1119_s18  ;;  %s1124_s20 = scalar_lea.hbm %s1532_s5, 2048 }
  0x2e   : > { %p1125_p10 = scmp.lt.u32.totalorder %s1366_s8, %s1532_s5  ;;  %p1126_p12 = scmp.lt.u32.totalorder %s1124_s20, %s1119_s18 }
  0x2f   : > { %p1122_p5 = pnand %p1120_p4, %p1091_p11  ;;  %p1128_p1 = scmp.lt.u32.totalorder %s1119_s18, %s1366_s8 }
  0x30   : > { %p1127_p0 = por %p1126_p12, %p1125_p10 }
  0x31   : > { %p1123_p6 = pneg %p1122_p5 }
  0x32   : > { %p1129_p2 = por %p1128_p1, %p1127_p0 }
  0x34   : > { %p1130_p9 = pnand %p1129_p2, %p1123_p6 }
  0x36   : > { %1133 = shalt.err (!%p1130_p9)
}
  0x37   : > { %s1134_s12 = scalar_lea.vmem %s1376_s17, 1024  ;;  %s1222_s30 = smov [#allocation5]  }
  0x38   : > { %p1135_p13 = scmp.ne.s32.totalorder %s1376_s17, %s1134_s12  ;;  %s1139_s15 = sshll.u32 %s1222_s30, 4  ;;  %s1140_s15 = int_to_ptr.vmem [resolvable:$false] %s1139_s15 }
  0x39   : > { %s1141_s27 = scalar_lea.vmem %s1140_s15, 2048  ;;  %p1142_p7 = scmp.lt.s32.totalorder %s1376_s17, %s1140_s15 }
  0x3a   : > { %p1137_p4 = pnand %p1135_p13, %p1091_p11  ;;  %p1143_p10 = scmp.lt.s32.totalorder %s1141_s27, %s1134_s12 }
  0x3c   : > { %p1138_p5 = pneg %p1137_p4  ;;  %p1144_p12 = por %p1143_p10, %p1142_p7 }
  0x3e   : > { %p1145_p0 = pnand %p1144_p12, %p1138_p5 }
  0x40   : > { %1148 = shalt.err (!%p1145_p0)
}
  0x41   : > { %1024 = dma.hbm_to_vmem [thread:$0]  (!%p1324_p8), %s1366_s8, 1024, %s1376_s17, %s269_s16, %s1220_s21, %s1220_s21, %s1221_s23  }
  0x42   : > { %298 = sbr.rel (%p1370_p3) target bundleno = 825 (0x339), region = 48  ;;  %s300_s18 = sand.u32 (!%p1370_p3), 1, %s1209_s25  }
  0x43   : > { %s896_s13 = sshll.u32 (!%p1370_p3), %s300_s18, 6  ;;  %s301_s20 = scalar_lea.sflag (!%p1370_p3), [#allocation3], %s300_s18 }
  0x44   : > { %s1410_s22 = scalar_lea.vmem (!%p1370_p3), [#allocation2], %s896_s13  ;;  %p1540_p7 = scmp.ne.s32.totalorder (!%p1370_p3), %s1536_s10, 0 }
  0x49   : > { %1192 = dma.done.wait (%p1540_p7), %s301_s20, 1024  }
  0x4a   : > { %1194 = vsyncadd (%p1540_p7), %s301_s20, 4294966272  ;;  %s310_s11 = scalar_lea.sflag [#allocation6], %s300_s18  ;;  %s1416_s19 = scalar_lea.vmem [#allocation5], %s896_s13 }
  0x4b   : > { %1196 = dma.done.wait (%p1540_p7), %s310_s11, 1024  }
  0x4c   : > { %1198 = vsyncadd (%p1540_p7), %s310_s11, 4294966272  ;;  %p353_p8 = scmp.lt.s32.totalorder %s1287_s28, 1  ;;  %p900_p11 = scmp.ne.s32.totalorder %s1287_s28, 0 }
  0x4d   : > { %v367_v0 = vld [vmem:[%s1527_s0] sm:$0xff] (!%p900_p11)  ;;  %v368_v1 = vld [vmem:[%s1527_s0 + $0x8] sm:$0xff] (!%p900_p11) }
  0x4e   : > { %s354_s21 = scalar_select %p353_p8, %s1287_s28, 1 }
  0x4f   : > { %366 = sbr.rel (%p900_p11) target bundleno = 86 (0x56), region = 60  ;;  %369 = vst [vmem:[#allocation7] sm:$0xff] (!%p900_p11), %v367_v0  ;;  %370 = vst [vmem:[#allocation7 + $0x8] sm:$0xff] (!%p900_p11), %v368_v1 }
  0x50   : > { %s1009_s23 = smul.u32 12, %s354_s21  ;;  %s899_s8 = sshll.u32 %s354_s21, 2 }
  0x51   : > { %s1427_s16 = scalar_lea.vmem %s1533_s6, %s899_s8 }
  0x52   : > { %s357_s30 = scalar_lea.vmem %s1530_s3, %s1009_s23 }
  0x56 PF: > { %v1067_v2 = vld [vmem:[%s357_s30] sm:$0xff]   ;;  %v1223_v3 = vmov 0.0   ;;  %v372_v5 = vld [vmem:[#allocation7 + $0x8] sm:$0xff]  ;;  %vm408_vm0 = vcmask 1040384   ;;  %vm1224_vm1 = vmmov 0   ;;  %vm458_vm2 = vcmask 130048  }
  0x57   : > { %953 = vmatprep.subr.bf16.mxu1 %v1223_v3  ;;  %961 = vmatprep.subr.bf16.mxu0 %v1223_v3  ;;  %v371_v4 = vld [vmem:[#allocation7] sm:$0xff]  ;;  %v1068_v7 = vld [vmem:[%s357_s30 + $0x8] ss:$0 sps:$4 sm:$0x11]   ;;  %vm404_vm3 = vcmask 146432   ;;  %v1073_v13 = vld [vmem:[%s1410_s22 + $0x10] sm:$0xff]   ;;  %v521_v38 = vlaneseq }
  0x58   : > { %954 = vmatpush3.bf16.msra.mxu1 %v1067_v2  ;;  %v384_v6 = vpack.c.bf16 %v372_v5, %v371_v4  ;;  %963 = vmatprep.mubr.msk.bf16.mxu0 %vm1224_vm1, %v1223_v3  ;;  %v1069_v8 = vld [vmem:[%s1528_s1] sm:$0xff]   ;;  %v410_v9 = vsel %vm408_vm0, %v1068_v7, 0  ;;  %v1072_v12 = vld [vmem:[%s1410_s22 + $0x8] sm:$0xff]   ;;  %v1074_v14 = vld [vmem:[%s1410_s22 + $0x18] sm:$0xff]   ;;  %p923_p3 = scmp.eq.s32.totalorder %s1287_s28, 1 }
  0x59   : > { %955 = vmatprep.subr.bf16.mxu1 %v1223_v3  ;;  %957 = vmatprep.mubr.msk.bf16.mxu1 %vm1224_vm1, %v1223_v3  ;;  %v1070_v10 = vld [vmem:[%s1529_s2] sm:$0xff]   ;;  %v1076_v16 = vld [vmem:[%s1410_s22 + $0x28] sm:$0xff]   ;;  %v1077_v17 = vld [vmem:[%s1410_s22 + $0x30] sm:$0xff]   ;;  %v522_v39 = vshrl.u32 %v521_v38, 7 }
  0x5a   : > { %962 = vmatpush3.bf16.msra.mxu0 %v384_v6  ;;  %v1071_v11 = vld [vmem:[%s1410_s22] sm:$0xff]   ;;  %v1078_v18 = vld [vmem:[%s1410_s22 + $0x38] sm:$0xff]   ;;  %v1080_v20 = vld [vmem:[%s1416_s19 + $0x8] sm:$0xff]  }
  0x5b   : > { %987 = vmatprep.subr.bf16.mxu0 %v1223_v3  ;;  %v1075_v15 = vld [vmem:[%s1410_s22 + $0x20] sm:$0xff]   ;;  %v1081_v21 = vld [vmem:[%s1416_s19 + $0x10] sm:$0xff]   ;;  %v1082_v22 = vld [vmem:[%s1416_s19 + $0x18] sm:$0xff]   ;;  %v523_v40 = vsub.s32 0, %v522_v39  ;;  %v635_v52 = vsub.s32 1, %v522_v39 }
  0x5c   : > { %956 = vmatpush3.bf16.msra.mxu1 %v410_v9  ;;  %v1079_v19 = vld [vmem:[%s1416_s19] sm:$0xff]   ;;  %v1084_v24 = vld [vmem:[%s1416_s19 + $0x28] sm:$0xff]   ;;  %v1085_v36 = vld [vmem:[%s1416_s19 + $0x30] sm:$0xff]  }
  0x5d   : > { %964 = vmatmul.mubr.msk.bf16.vlgmr.msra.gmra.mrb[0].mxu0 %vm458_vm2, %v1069_v8  ;;  %967 = vmatprep.subr.bf16.mxu1 %v1223_v3  ;;  %v1083_v23 = vld [vmem:[%s1416_s19 + $0x20] sm:$0xff]   ;;  %v1086_v37 = vld [vmem:[%s1416_s19 + $0x38] sm:$0xff]  }
  0x5e   : > { %1003 = vmatprep.mubr.msk.bf16.mxu0 %vm1224_vm1, %v1223_v3  ;;  %988 = vmatpush3.bf16.msra.mxu0 %v1079_v19  ;;  %v503_v41 = vld [vmem:[%s1427_s16] sm:$0xf]  ;;  %v756_v19 = vsub.s32 2, %v522_v39 }
  0x5f   : > { %958 = vmatmul.mubr.msk.bf16.vlgmr.msra.gmra.mrb[0].mxu1 %vm404_vm3, %v1070_v10  ;;  %989 = vmatprep.subr.bf16.mxu0 %v1223_v3  ;;  %v524_v42 = vrot.slane %v503_v41, %v523_v40  ;;  %v636_v53 = vrot.slane %v503_v41, %v635_v52 }
  0x60   : > { %968 = vmatpush3.bf16.msra.mxu1 %v1071_v11  ;;  %983 = vmatprep.mubr.msk.bf16.mxu1 %vm1224_vm1, %v1223_v3 }
  0x61   : > { %969 = vmatprep.subr.bf16.mxu1 %v1223_v3 }
  0x62   : > { %990 = vmatpush3.bf16.msra.mxu0 %v1080_v20  ;;  %v762_v20 = vsub.s32 3, %v522_v39 }
  0x63   : > { %991 = vmatprep.subr.bf16.mxu0 %v1223_v3 }
  0x64   : > { %970 = vmatpush3.bf16.msra.mxu1 %v1072_v12 }
  0x65   : > { %971 = vmatprep.subr.bf16.mxu1 %v1223_v3 }
  0x66   : > { %992 = vmatpush3.bf16.msra.mxu0 %v1081_v21  ;;  %v757_v21 = vrot.slane %v503_v41, %v756_v19 }
  0x67   : > { %993 = vmatprep.subr.bf16.mxu0 %v1223_v3 }
  0x68   : > { %972 = vmatpush3.bf16.msra.mxu1 %v1073_v13 }
  0x69   : > { %973 = vmatprep.subr.bf16.mxu1 %v1223_v3 }
  0x6a   : > { %994 = vmatpush3.bf16.msra.mxu0 %v1082_v22 }
  0x6b   : > { %995 = vmatprep.subr.bf16.mxu0 %v1223_v3 }
  0x6c   : > { %974 = vmatpush3.bf16.msra.mxu1 %v1074_v14 }
  0x6d   : > { %975 = vmatprep.subr.bf16.mxu1 %v1223_v3 }
  0x6e   : > { %996 = vmatpush3.bf16.msra.mxu0 %v1083_v23  ;;  %v763_v23 = vrot.slane %v503_v41, %v762_v20 }
  0x6f   : > { %997 = vmatprep.subr.bf16.mxu0 %v1223_v3 }
  0x70   : > { %976 = vmatpush3.bf16.msra.mxu1 %v1075_v15 }
  0x71   : > { %977 = vmatprep.subr.bf16.mxu1 %v1223_v3 }
  0x72   : > { %998 = vmatpush3.bf16.msra.mxu0 %v1084_v24 }
  0x73   : > { %999 = vmatprep.subr.bf16.mxu0 %v1223_v3 }
  0x74   : > { %978 = vmatpush3.bf16.msra.mxu1 %v1076_v16 }
  0x75   : > { %979 = vmatprep.subr.bf16.mxu1 %v1223_v3 }
  0x76   : > { %1000 = vmatpush3.bf16.msra.mxu0 %v1085_v36 }
  0x77   : > { %1001 = vmatprep.subr.bf16.mxu0 %v1223_v3 }
  0x78   : > { %980 = vmatpush3.bf16.msra.mxu1 %v1077_v17 }
  0x79   : > { %981 = vmatprep.subr.bf16.mxu1 %v1223_v3 }
  0x7a   : > { %1002 = vmatpush3.bf16.msra.mxu0 %v1086_v37 }
  0x7c   : > { %982 = vmatpush3.bf16.msra.mxu1 %v1078_v18 }
 0x130   : > { %v496_v25 = vpop.f32.mrb[0].mxu0 }
 0x131   : > { %v965_v26 = vpop.f32.mrb[1].mxu0 }
 0x132   : > { %v499_v27 = vpop.f32.mrb[2].mxu0  ;;  %v446_v28 = vpop.f32.mrb[0].mxu1 }
 0x133   : > { %v497_v29 = vadd.f32 %v496_v25, %v446_v28  ;;  %v966_v30 = vpop.f32.mrb[3].mxu0  ;;  %v959_v31 = vpop.f32.mrb[1].mxu1 }
 0x134   : > { %v449_v32 = vpop.f32.mrb[2].mxu1 }
 0x135   : > { %v500_v33 = vadd.f32 %v499_v27, %v449_v32  ;;  %v960_v34 = vpop.f32.mrb[3].mxu1 }
 0x137   : > { %v504_v35 = vpack.c.bf16 %v500_v33, %v497_v29 }
 0x139   : > { %984 = vmatmul.mubr.bf16.vlgmr.msra.gmra.mrb[4].mxu1 %v504_v35 }
 0x20c   : > { %v607_v43 = vpop.f32.mrb[4].mxu1 }
 0x20d   : > { %v608_v44 = vadd.f32 %v607_v43, %v524_v42  ;;  %v985_v45 = vpop.f32.mrb[5].mxu1 }
 0x20e   : > { %v610_v46 = vpop.f32.mrb[6].mxu1 }
 0x20f   : > { %v611_v47 = vadd.f32 %v610_v46, %v524_v42  ;;  %v986_v48 = vpop.f32.mrb[7].mxu1  ;;  %v614_v49 = vmax.f32 %v608_v44, 0.0 }
 0x211   : > { %v615_v50 = vmax.f32 %v611_v47, 0.0 }
 0x213   : > { %v616_v51 = vpack.c.bf16 %v615_v50, %v614_v49 }
 0x215   : > { %1004 = vmatmul.mubr.bf16.vlgmr.msra.gmra.mrb[4].mxu0 %v616_v51 }
 0x2e8   : > { %v719_v54 = vpop.f32.mrb[4].mxu0 }
 0x2e9   : > { %v720_v55 = vadd.f32 %v719_v54, %v636_v53  ;;  %v1005_v56 = vpop.f32.mrb[5].mxu0 }
 0x2ea   : > { %v722_v57 = vpop.f32.mrb[6].mxu0 }
 0x2eb   : > { %v723_v58 = vadd.f32 %v722_v57, %v636_v53  ;;  %v1006_v59 = vpop.f32.mrb[7].mxu0  ;;  %v736_v60 = vmul.f32 %v720_v55, %v720_v55 }
 0x2ed   : > { %v728_v61 = vadd.f32 %v723_v58, %v720_v55  ;;  %v737_v62 = vmul.f32 %v723_v58, %v723_v58 }
 0x2ef   : > { %v729_v63 = vrot.slane %v728_v61, 4  ;;  %v738_v0 = vadd.f32 %v737_v62, %v736_v60 }
 0x2f1   : > { %v730_v1 = vadd.f32 %v729_v63, %v728_v61  ;;  %v739_v2 = vrot.slane %v738_v0, 4 }
 0x2f3   : > { %v731_v3 = vrot.slane %v730_v1, 2  ;;  %v740_v4 = vadd.f32 %v739_v2, %v738_v0 }
 0x2f5   : > { %v732_v5 = vadd.f32 %v731_v3, %v730_v1  ;;  %v741_v6 = vrot.slane %v740_v4, 2 }
 0x2f7   : > { %v733_v7 = vrot.slane %v732_v5, 1  ;;  %v742_v8 = vadd.f32 %v741_v6, %v740_v4 }
 0x2f9   : > { %v734_v9 = vadd.f32 %v733_v7, %v732_v5  ;;  %v743_v10 = vrot.slane %v742_v8, 1 }
 0x2fb   : > { %v735_v11 = vmul.f32 0.0625, %v734_v9  ;;  %v744_v12 = vadd.f32 %v743_v10, %v742_v8 }
 0x2fd   : > { %v745_v13 = vmul.f32 0.0625, %v744_v12  ;;  %v746_v14 = vmul.f32 %v735_v11, %v735_v11  ;;  %v748_v15 = vsub.f32 %v720_v55, %v735_v11  ;;  %v749_v16 = vsub.f32 %v723_v58, %v735_v11 }
 0x2ff   : > { %v747_v17 = vsub.f32 %v745_v13, %v746_v14 }
 0x301   : > { %v750_v18 = vadd.f32 1e-05, %v747_v17 }
 0x303   : > { %1087 = vrsqrt.f32 %v750_v18 }
 0x30d   : > { %v1088_v22 = vpop.eup %1087 }
 0x30e   : > { %v752_v24 = vmul.f32 %v1088_v22, %v748_v15  ;;  %v753_v25 = vmul.f32 %v1088_v22, %v749_v16  ;;  %773 = sbr.rel (%p923_p3) target bundleno = 799 (0x31f), region = 64 }
 0x310   : > { %v758_v26 = vmul.f32 %v757_v21, %v752_v24  ;;  %v759_v27 = vmul.f32 %v757_v21, %v753_v25 }
 0x312   : > { %v764_v28 = vadd.f32 %v763_v23, %v758_v26  ;;  %v765_v29 = vadd.f32 %v763_v23, %v759_v27 }
 0x314   : > { %768 = vst [vmem:[#allocation7] sm:$0xff] %v764_v28  ;;  %769 = vst [vmem:[#allocation7 + $0x8] sm:$0xff] %v765_v29 }
 0x31b   : > { %v774_v30 = vld [vmem:[#allocation7] sm:$0xff]  ;;  %v775_v31 = vld [vmem:[#allocation7 + $0x8] sm:$0xff] }
 0x31c   : > { %v776_v32 = vmax.f32 %v774_v30, 0.0  ;;  %v777_v33 = vmax.f32 %v775_v31, 0.0 }
 0x31e   : > { %778 = vst [vmem:[#allocation7] sm:$0xff] %v776_v32  ;;  %779 = vst [vmem:[#allocation7 + $0x8] sm:$0xff] %v777_v33 }
 0x31f PF: > { %s1225_s22 = smov [#allocation7]  }
 0x320   : > { %s786_s19 = sshll.u32 %s1225_s22, 4  ;;  %s787_s19 = int_to_ptr.vmem [resolvable:$true] %s786_s19 }
 0x321   : > { %s1149_s23 = scalar_lea.vmem %s787_s19, 256  ;;  %p1156_p9 = scmp.lt.s32.totalorder %s787_s19, %s787_s19 }
 0x322   : > { %p1150_p6 = scmp.ne.s32.totalorder %s787_s19, %s1149_s23  ;;  %p1157_p13 = scmp.lt.s32.totalorder %s1149_s23, %s1149_s23 }
 0x324   : > { %p1151_p1 = pnand %p1150_p6, %p923_p3  ;;  %p1158_p4 = por %p1157_p13, %p1156_p9 }
 0x326   : > { %p1152_p2 = pneg %p1151_p1 }
 0x328   : > { %p1159_p5 = pnand %p1158_p4, %p1152_p2 }
 0x32a   : > { %1162 = shalt.err (!%p1159_p5)
}
 0x32b   : > { %s1163_s17 = scalar_lea.hbm %s1534_s7, 256 }
 0x32c   : > { %p1164_p10 = scmp.ne.s32.totalorder %s1534_s7, %s1163_s17  ;;  %p1169_p7 = scmp.lt.u32.totalorder %s1163_s17, %s1534_s7 }
 0x32e   : > { %p1165_p12 = pnand %p1164_p10, %p923_p3 }
 0x330   : > { %p1166_p0 = pneg %p1165_p12 }
 0x332   : > { %p1171_p8 = pnand %p1169_p7, %p1166_p0 }
 0x334   : > { %1174 = shalt.err (!%p1171_p8)
}
 0x335   : > { %s1226_s10 = smov 128   ;;  %s1227_s15 = smov 8  }
 0x336   : > { %1015 = dma.vmem_to_hbm [thread:$0]  (%p923_p3), %s787_s19, 256, %s1534_s7, [#allocation4], %s1226_s10, %s1226_s10, %s1227_s15  }
 0x337   : > { %1200 = dma.done.wait (%p923_p3), [#allocation4], 256  }
 0x338   : > { %1202 = vsyncadd (%p923_p3), [#allocation4], 4294967040 }
 0x339 PF: > { %p21_p11 = scmp.ge.s32.totalorder %s1290_s29, 4   ;;  %s1541_s24 = smov %s1209_s25 }
 0x33a   : > { %s1542_s25 = smov %s1213_s26  ;;  %s1543_s26 = smov %s1300_s9 }
 0x33b   : > { %s1544_s27 = smov %s1290_s29  ;;  %23 = sbr.rel (!%p21_p11) target bundleno = 6 (0x6), region = 112 }
 0x342   :  { %802 = vsyncpa [#allocation3], 1 }
 0x343   :  { %804 = vsyncpa [#allocation3 + $0x1], 1 }
 0x344   :  { %805 = vsyncpa [#allocation6], 1 }
 0x345   :  { %807 = vsyncpa [#allocation6 + $0x1], 1 }
 0x346   :  { %808 = vsyncpa [#allocation4], 1 }
 0x347   :  { %810 = vsyncpa [#allocation4 + $0x1], 1 }

</bundles_post_ra>
